<compile_context>
chip_gen: v5e
topology: v5e:2x2
jax: 0.10.0
libtpu: 0.0.40
codegen_flags: <defaults>
</compile_context>

<pallas_src>
import jax
import jax.numpy as jnp
from jax.experimental import pallas as pl
from jax.experimental.pallas import tpu as pltpu

LANE = 128  # lane width; hidden (10) and output (t_salida) dims are zero-padded to this


def narnn_kernel(x_ref, w1_ref, w2_ref, w3_ref, b_ref, o_ref):
    # x_ref : (block_b, t_in)          activation tile (the only thing that scales)
    # w1_ref: (t_in, LANE)             resident in VMEM (constant index_map)
    # w2_ref: (LANE, LANE)             resident
    # w3_ref: (LANE, LANE)             resident
    # b_ref : (3, LANE)                rows = [b1, b2, b3], zero-padded, resident
    # o_ref : (block_b, LANE)          lane-dense output tile (cols >= t_out are 0)
    x = x_ref[...]
    b = b_ref[...]

    # fc1 + tan-sigmoid = tanh(sigmoid(.))
    h1 = jnp.dot(x, w1_ref[...], preferred_element_type=jnp.float32) + b[0:1, :]
    h1 = jnp.tanh(jax.nn.sigmoid(h1))

    # fc2 + log-sigmoid.  Zero-padded weight rows annihilate the nonzero values
    # produced in the padded columns of h1, so the padding never leaks.
    h2 = jnp.dot(h1, w2_ref[...], preferred_element_type=jnp.float32) + b[1:2, :]
    h2 = jax.nn.log_sigmoid(h2)

    # fc3 (linear output)
    y = jnp.dot(h2, w3_ref[...], preferred_element_type=jnp.float32) + b[2:3, :]
    o_ref[...] = y.astype(o_ref.dtype)


def _pad_to(a, shape):
    """Zero-pad array `a` up to `shape` (same rank)."""
    out = jnp.zeros(shape, a.dtype)
    return out.at[tuple(slice(0, s) for s in a.shape)].set(a)


def narnn_forward(x, params, *, block_b=128):
    """x: [B, t_entrada] float32. params in PyTorch layout (W: [out, in], b: [out])."""
    B, t_in = x.shape
    w1, b1 = params["w1"], params["b1"]   # (10, t_in), (10,)
    w2, b2 = params["w2"], params["b2"]   # (10, 10),   (10,)
    w3, b3 = params["w3"], params["b3"]   # (t_out, 10),(t_out,)
    t_out = w3.shape[0]

    # Pre-transpose to [in, out] and zero-pad hidden/output dims to LANE so every
    # matmul operand and the output store are lane-dense.
    w1p = _pad_to(w1.T, (t_in, LANE))
    w2p = _pad_to(w2.T, (LANE, LANE))
    w3p = _pad_to(w3.T, (LANE, LANE))
    b_all = jnp.stack([_pad_to(b1, (LANE,)),
                       _pad_to(b2, (LANE,)),
                       _pad_to(b3, (LANE,))])          # (3, LANE)

    # Pad the batch to a multiple of the batch tile; grid iterates over tiles.
    n_tiles = pl.cdiv(B, block_b)
    B_pad = n_tiles * block_b
    x_p = _pad_to(x, (B_pad, t_in)) if B_pad != B else x

    cost = pl.CostEstimate(
        flops=2 * B_pad * (t_in * LANE + LANE * LANE + LANE * LANE),
        transcendentals=3 * B_pad * LANE,
        bytes_accessed=(x_p.size + w1p.size + w2p.size + w3p.size + b_all.size
                        + B_pad * LANE) * 4,
    )

    out = pl.pallas_call(
        narnn_kernel,
        out_shape=jax.ShapeDtypeStruct((B_pad, LANE), x.dtype),
        grid=(n_tiles,),
        in_specs=[
            pl.BlockSpec((block_b, t_in), lambda i: (i, 0)),   # x: tiled over batch
            pl.BlockSpec((t_in, LANE), lambda i: (0, 0)),      # weights/biases: constant
            pl.BlockSpec((LANE, LANE), lambda i: (0, 0)),      #   block index -> stay
            pl.BlockSpec((LANE, LANE), lambda i: (0, 0)),      #   resident in VMEM
            pl.BlockSpec((3, LANE), lambda i: (0, 0)),
        ],
        out_specs=pl.BlockSpec((block_b, LANE), lambda i: (i, 0)),
        compiler_params=pltpu.CompilerParams(
            dimension_semantics=("parallel",)),                # megacore split on v7x
        cost_estimate=cost,
    )(x_p, w1p, w2p, w3p, b_all)

    # Drop batch padding and the padded output lanes.
    return out[:B, :t_out]


def init_params(key, t_entrada, t_salida):
    """Deterministic synthetic init mimicking nn.Linear's uniform(-1/sqrt(in), 1/sqrt(in))."""
    def linear(k, fan_in, fan_out):
        kw, kb = jax.random.split(k)
        bound = 1.0 / jnp.sqrt(fan_in)
        w = jax.random.uniform(kw, (fan_out, fan_in), jnp.float32, -bound, bound)
        b = jax.random.uniform(kb, (fan_out,), jnp.float32, -bound, bound)
        return w, b

    k1, k2, k3 = jax.random.split(key, 3)
    w1, b1 = linear(k1, t_entrada, 10)
    w2, b2 = linear(k2, 10, 10)
    w3, b3 = linear(k3, 10, t_salida)
    return {"w1": w1, "b1": b1, "w2": w2, "b2": b2, "w3": w3, "b3": b3}


def narnn_reference(x, p):
    """Pure-JAX reference matching the PyTorch forward."""
    h1 = jnp.tanh(jax.nn.sigmoid(x @ p["w1"].T + p["b1"]))
    h2 = jax.nn.log_sigmoid(h1 @ p["w2"].T + p["b2"])
    return h2 @ p["w3"].T + p["b3"]


if __name__ == "__main__":
    key = jax.random.PRNGKey(0)
    k_params, k_x = jax.random.split(key)

    batch = 256      # many windows of the series predicted at once (2 batch tiles)
    t_entrada = 8    # n previous values of the series
    t_salida = 1     # one predicted value

    params = init_params(k_params, t_entrada, t_salida)
    x = jax.random.normal(k_x, (batch, t_entrada), jnp.float32)

    out = narnn_forward(x, params)
    out = jax.block_until_ready(out)

    ref = narnn_reference(x, params)
    assert out.shape == (batch, t_salida)
    assert jnp.allclose(out, ref, atol=1e-5, rtol=1e-5), (out, ref)

    print("KERNEL_OK")
</pallas_src>

<mosaic_0001>
module attributes {stable_mosaic.version = 11 : i64} {
  func.func @narnn_kernel(%arg0: i32, %arg1: memref<128x8xf32, #tpu.memory_space<vmem>>, %arg2: memref<8x128xf32, #tpu.memory_space<vmem>>, %arg3: memref<128x128xf32, #tpu.memory_space<vmem>>, %arg4: memref<128x128xf32, #tpu.memory_space<vmem>>, %arg5: memref<3x128xf32, #tpu.memory_space<vmem>>, %arg6: memref<128x128xf32, #tpu.memory_space<vmem>>) attributes {dimension_semantics = [#tpu.dimension_semantics<parallel>], iteration_bounds = array<i64: 2>, scalar_prefetch = 0 : i64, scratch_operands = 0 : i64, tpu.core_type = #tpu.core_type<tc>, window_params = [{transform_indices = @transform_0, window_bounds = array<i64: 128, 8>}, {pipeline_mode = #tpu.pipeline_mode<synchronous>, transform_indices = @transform_1, window_bounds = array<i64: 8, 128>}, {pipeline_mode = #tpu.pipeline_mode<synchronous>, transform_indices = @transform_2, window_bounds = array<i64: 128, 128>}, {pipeline_mode = #tpu.pipeline_mode<synchronous>, transform_indices = @transform_3, window_bounds = array<i64: 128, 128>}, {pipeline_mode = #tpu.pipeline_mode<synchronous>, transform_indices = @transform_4, window_bounds = array<i64: 3, 128>}, {transform_indices = @transform_5, window_bounds = array<i64: 128, 128>}]} {
    %c0 = arith.constant 0 : index
    %c0_0 = arith.constant 0 : index
    %0 = vector.load %arg1[%c0, %c0_0] : memref<128x8xf32, #tpu.memory_space<vmem>>, vector<128x8xf32>
    %c0_1 = arith.constant 0 : index
    %c0_2 = arith.constant 0 : index
    %1 = vector.load %arg5[%c0_1, %c0_2] : memref<3x128xf32, #tpu.memory_space<vmem>>, vector<3x128xf32>
    %c0_3 = arith.constant 0 : index
    %c0_4 = arith.constant 0 : index
    %2 = vector.load %arg2[%c0_3, %c0_4] : memref<8x128xf32, #tpu.memory_space<vmem>>, vector<8x128xf32>
    %cst = arith.constant dense<0.000000e+00> : vector<128x128xf32>
    %3 = tpu.matmul %0, %2, %cst {dimension_numbers = #tpu.dot_dimension_numbers<[1], [0], [0], [1], [0, 0, 1, 1], [], []>} : vector<128x8xf32>, vector<8x128xf32>, vector<128x128xf32> -> vector<128x128xf32>
    %4 = vector.extract_strided_slice %1 {offsets = [0, 0], sizes = [1, 128], strides = [1, 1]} : vector<3x128xf32> to vector<1x128xf32>
    %5 = vector.broadcast %4 : vector<1x128xf32> to vector<128x128xf32>
    %6 = arith.addf %3, %5 : vector<128x128xf32>
    %7 = arith.negf %6 : vector<128x128xf32>
    %8 = math.exp %7 : vector<128x128xf32>
    %cst_5 = arith.constant 1.000000e+00 : f32
    %9 = vector.broadcast %cst_5 : f32 to vector<128x128xf32>
    %10 = arith.addf %9, %8 : vector<128x128xf32>
    %11 = arith.divf %9, %10 : vector<128x128xf32>
    %12 = math.tanh %11 : vector<128x128xf32>
    %c0_6 = arith.constant 0 : index
    %c0_7 = arith.constant 0 : index
    %13 = vector.load %arg3[%c0_6, %c0_7] : memref<128x128xf32, #tpu.memory_space<vmem>>, vector<128x128xf32>
    %cst_8 = arith.constant dense<0.000000e+00> : vector<128x128xf32>
    %14 = tpu.matmul %12, %13, %cst_8 {dimension_numbers = #tpu.dot_dimension_numbers<[1], [0], [0], [1], [0, 0, 1, 1], [], []>} : vector<128x128xf32>, vector<128x128xf32>, vector<128x128xf32> -> vector<128x128xf32>
    %15 = vector.extract_strided_slice %1 {offsets = [1, 0], sizes = [1, 128], strides = [1, 1]} : vector<3x128xf32> to vector<1x128xf32>
    %16 = vector.broadcast %15 : vector<1x128xf32> to vector<128x128xf32>
    %17 = arith.addf %14, %16 : vector<128x128xf32>
    %cst_9 = arith.constant 0.000000e+00 : f32
    %18 = vector.broadcast %cst_9 : f32 to vector<128x128xf32>
    %19 = arith.subf %18, %17 : vector<128x128xf32>
    %cst_10 = arith.constant 0.000000e+00 : f32
    %20 = vector.broadcast %cst_10 : f32 to vector<128x128xf32>
    %21 = arith.maximumf %19, %20 : vector<128x128xf32>
    %22 = vector.broadcast %cst_10 : f32 to vector<128x128xf32>
    %23 = arith.subf %19, %22 : vector<128x128xf32>
    %24 = arith.cmpf one, %23, %23 : vector<128x128xf32>
    %25 = vector.broadcast %cst_10 : f32 to vector<128x128xf32>
    %26 = arith.addf %19, %25 : vector<128x128xf32>
    %27 = math.absf %23 : vector<128x128xf32>
    %cst_11 = arith.constant 0.000000e+00 : f32
    %28 = vector.broadcast %cst_11 : f32 to vector<128x128xf32>
    %29 = arith.subf %28, %27 : vector<128x128xf32>
    %30 = math.exp %29 : vector<128x128xf32>
    %31 = math.log1p %30 : vector<128x128xf32>
    %32 = arith.addf %21, %31 : vector<128x128xf32>
    %33 = arith.select %24, %26, %32 : vector<128x128xi1>, vector<128x128xf32>
    %cst_12 = arith.constant 0.000000e+00 : f32
    %34 = vector.broadcast %cst_12 : f32 to vector<128x128xf32>
    %35 = arith.subf %34, %33 : vector<128x128xf32>
    %c0_13 = arith.constant 0 : index
    %c0_14 = arith.constant 0 : index
    %36 = vector.load %arg4[%c0_13, %c0_14] : memref<128x128xf32, #tpu.memory_space<vmem>>, vector<128x128xf32>
    %cst_15 = arith.constant dense<0.000000e+00> : vector<128x128xf32>
    %37 = tpu.matmul %35, %36, %cst_15 {dimension_numbers = #tpu.dot_dimension_numbers<[1], [0], [0], [1], [0, 0, 1, 1], [], []>} : vector<128x128xf32>, vector<128x128xf32>, vector<128x128xf32> -> vector<128x128xf32>
    %38 = vector.extract_strided_slice %1 {offsets = [2, 0], sizes = [1, 128], strides = [1, 1]} : vector<3x128xf32> to vector<1x128xf32>
    %39 = vector.broadcast %38 : vector<1x128xf32> to vector<128x128xf32>
    %40 = arith.addf %37, %39 : vector<128x128xf32>
    %c0_16 = arith.constant 0 : index
    %c0_17 = arith.constant 0 : index
    %41 = vector.load %arg6[%c0_16, %c0_17] : memref<128x128xf32, #tpu.memory_space<vmem>>, vector<128x128xf32>
    tpu.vector_store %arg6[%c0_16, %c0_17], %40 {strides = array<i32>} : memref<128x128xf32, #tpu.memory_space<vmem>>, vector<128x128xf32>,
    return
  }
  func.func @transform_0(%arg0: i32) -> (i32, i32) {
    %c0_i32 = arith.constant 0 : i32
    %c0_i32_0 = arith.constant 0 : i32
    return %arg0, %c0_i32 : i32, i32
  }
  func.func @transform_1(%arg0: i32) -> (i32, i32) {
    %c0_i32 = arith.constant 0 : i32
    %c0_i32_0 = arith.constant 0 : i32
    %c0_i32_1 = arith.constant 0 : i32
    return %c0_i32, %c0_i32_0 : i32, i32
  }
  func.func @transform_2(%arg0: i32) -> (i32, i32) {
    %c0_i32 = arith.constant 0 : i32
    %c0_i32_0 = arith.constant 0 : i32
    %c0_i32_1 = arith.constant 0 : i32
    return %c0_i32, %c0_i32_0 : i32, i32
  }
  func.func @transform_3(%arg0: i32) -> (i32, i32) {
    %c0_i32 = arith.constant 0 : i32
    %c0_i32_0 = arith.constant 0 : i32
    %c0_i32_1 = arith.constant 0 : i32
    return %c0_i32, %c0_i32_0 : i32, i32
  }
  func.func @transform_4(%arg0: i32) -> (i32, i32) {
    %c0_i32 = arith.constant 0 : i32
    %c0_i32_0 = arith.constant 0 : i32
    %c0_i32_1 = arith.constant 0 : i32
    return %c0_i32, %c0_i32_0 : i32, i32
  }
  func.func @transform_5(%arg0: i32) -> (i32, i32) {
    %c0_i32 = arith.constant 0 : i32
    %c0_i32_0 = arith.constant 0 : i32
    return %arg0, %c0_i32 : i32, i32
  }
}

</mosaic_0001>

<bundles_post_ra>
// kernel: tpu_custom_call.1
= control target key start
LH: loop header
LB: loop body
LE: loop exit
PB: predicated region body
PF: predicated region fallthrough
CT: control target
= control target key end

     0   :  { %10 = vsyncpa [#allocation3], 0  ;;  %s2009_s0 = inlined_call_operand.vmem [shape: f32[256,8], index: 0, kind: input, shape index: {}]   ;;  %s2010_s1 = inlined_call_operand.vmem [shape: f32[8,128], index: 1, kind: input, shape index: {}]   ;;  %s2011_s2 = inlined_call_operand.vmem [shape: f32[128,128], index: 2, kind: input, shape index: {}]   ;;  %s2012_s3 = inlined_call_operand.vmem [shape: f32[128,128], index: 3, kind: input, shape index: {}]   ;;  %s2013_s4 = inlined_call_operand.vmem [shape: f32[3,128], index: 4, kind: input, shape index: {}]   ;;  %s2014_s5 = inlined_call_operand.hbm [shape: f32[256,128], index: 5, kind: output, shape index: {}]  }
   0x1   :  { %12 = vsyncpa [#allocation3 + $0x1], 0  ;;  %s1632_s18 = smov 0   ;;  %s1634_s19 = smov 0  }
   0x2   :  { %s1636_s20 = smov 0   ;;  %s1638_s21 = smov 0  }
   0x3 LB: > { %s1653_s22 = sadd.s32 4294967295, %s1598_s21   ;;  %s1257_s23 = sadd.s32 4294967294, %s1598_s21   ;;  %s1598_s21 = sphi %s1638_s21, %s2020_s21   ;;  %s1594_s20 = sphi %s1636_s20, %s2019_s20   ;;  %s1590_s19 = sphi %s1634_s19, %s2018_s19   ;;  %s1586_s18 = sphi %s1632_s18, %s2017_s18  }
   0x4   : > { %s1657_s24 = sadd.s32 1, %s1598_s21   ;;  %s135_s25 = sadd.s32 1, %s1594_s20 }
   0x5   : > { %s132_s26 = ssub.s32 %s1598_s21, %s1657_s24  ;;  %p145_p0 = scmp.ne.s32.totalorder %s1594_s20, %s1590_s19 }
   0x6   : > { %p133_p1 = scmp.eq.s32.totalorder %s132_s26, 0  ;;  %p146_p2 = scmp.eq.s32.totalorder %s1653_s22, 1 }
   0x7   : > { %p151_p3 = scmp.ne.s32.totalorder %s1590_s19, %s1586_s18  ;;  %p152_p4 = scmp.eq.s32.totalorder %s1257_s23, 1 }
   0x8   : > { %s1668_s27 = scalar_select %p133_p1, %s1594_s20, %s135_s25  }
   0x9   : > { %p1670_p5 = por %p146_p2, %p145_p0  ;;  %p1674_p6 = por %p152_p4, %p151_p3 }
   0xa   : > { %p1260_p7 = scmp.ge.s32.totalorder %s1598_s21, 1  ;;  %p191_p8 = scmp.lt.s32.totalorder %s1598_s21, 3 }
   0xc   : > { %p192_p9 = pnand %p1260_p7, %p191_p8 }
   0xd   : > { %s1262_s7 = sshll.u32 (!%p192_p9), %s1653_s22, 4  ;;  %s216_s15 = sand.u32 (!%p192_p9), 1, %s1590_s19  }
   0xe   : > { %195 = sbr.rel (%p192_p9) target bundleno = 610 (0x262), region = 40  ;;  %p220_p10 = scmp.lt.s32.totalorder (!%p192_p9), %s1262_s7, 31 }
   0xf   : > { %s1261_s16 = sshll.u32 (!%p192_p9), %s216_s15, 7  ;;  %s1301_s26 = sshll.u32 (!%p192_p9), %s1653_s22, 7 }
  0x10   : > { %s1957_s25 = scalar_lea.vmem (!%p192_p9), [#allocation2], %s1261_s16  ;;  %s1191_s6 = scalar_lea.hbm (!%p192_p9), %s2014_s5, %s1301_s26 }
  0x11   : > { %s1180_s9 = scalar_lea.sflag (!%p192_p9), [#allocation3], %s216_s15  ;;  %s1556_s14 = scalar_lea.hbm (!%p192_p9), %s2014_s5, 256 }
  0x13   : > { %v243_v0 = vld [vmem:[%s2010_s1] sm:$0xff]  ;;  %s2022_s7 = smov (!%p220_p10, %s1262_s7), 31  ;;  %vm245_vm0 = vcmask 64512   ;;  %v694_v14 = vld [vmem:[%s2011_s2 + $0x78] sm:$0xff]  ;;  %v693_v16 = vld [vmem:[%s2011_s2 + $0x70] sm:$0xff] }
  0x14   : > { %309 = vmatpush.msra.mxu0 %v243_v0  ;;  %s1263_s8 = sshll.u32 %s2022_s7, 3  ;;  %696 = vmatpush.msra.mxu1 %v694_v14  ;;  %v692_v17 = vld [vmem:[%s2011_s2 + $0x68] sm:$0xff]  ;;  %v691_v18 = vld [vmem:[%s2011_s2 + $0x60] sm:$0xff]  ;;  %v690_v19 = vld [vmem:[%s2011_s2 + $0x58] sm:$0xff]  ;;  %s1192_s7 = sshll.u32 %s1957_s25, 4  ;;  %s1193_s7 = int_to_ptr.vmem [resolvable:$true] %s1192_s7 }
  0x15   : > { %s1687_s11 = scalar_lea.vmem %s2009_s0, %s1263_s8  ;;  %1302 = vmatpush.msra.mxu3 %v694_v14  ;;  %v689_v21 = vld [vmem:[%s2011_s2 + $0x50] sm:$0xff]  ;;  %v688_v22 = vld [vmem:[%s2011_s2 + $0x48] sm:$0xff]  ;;  %v687_v23 = vld [vmem:[%s2011_s2 + $0x40] sm:$0xff]  ;;  %s1194_s8 = sshll.u32 %s1191_s6, 4  ;;  %s1195_s8 = int_to_ptr.hbm [resolvable:$true] %s1194_s8 }
  0x16   : > { %v226_v1 = vld [vmem:[%s1687_s11] sm:$0xff]  ;;  %v227_v2 = vld [vmem:[%s1687_s11 + $0x8] sm:$0xff]  ;;  %v228_v3 = vld [vmem:[%s1687_s11 + $0x10] sm:$0xff]  ;;  %697 = vmatpush.msra.mxu1 %v693_v16  ;;  %s1550_s10 = sshra.s32 %s1195_s8, 4  ;;  %s1551_s10 = int_to_ptr.hbm [resolvable:$true] %s1550_s10 }
  0x17   : > { %1264 = vmatmul.msk.f32.vlgmr.msra.gmra.mxu0 %vm245_vm0, %v226_v1  ;;  %v229_v4 = vld [vmem:[%s1687_s11 + $0x18] sm:$0xff]  ;;  %v230_v5 = vld [vmem:[%s1687_s11 + $0x20] sm:$0xff]  ;;  %v231_v6 = vld [vmem:[%s1687_s11 + $0x28] sm:$0xff]  ;;  %1303 = vmatpush.msra.mxu3 %v693_v16  ;;  %s1552_s22 = scalar_lea.hbm %s1551_s10, 128  ;;  %p1557_p0 = scmp.lt.s32.totalorder %s1551_s10, %s2014_s5 }
  0x18   : > { %v232_v7 = vld [vmem:[%s1687_s11 + $0x30] sm:$0xff]  ;;  %v233_v8 = vld [vmem:[%s1687_s11 + $0x38] sm:$0xff]  ;;  %v234_v9 = vld [vmem:[%s1687_s11 + $0x40] sm:$0xff]  ;;  %698 = vmatpush.msra.mxu1 %v692_v17  ;;  %p1553_p11 = scmp.ne.s32.totalorder %s1551_s10, %s1552_s22  ;;  %p1558_p1 = scmp.lt.s32.totalorder %s1556_s14, %s1552_s22 }
  0x19   : > { %v235_v10 = vld [vmem:[%s1687_s11 + $0x48] sm:$0xff]  ;;  %v236_v11 = vld [vmem:[%s1687_s11 + $0x50] sm:$0xff]  ;;  %v237_v12 = vld [vmem:[%s1687_s11 + $0x58] sm:$0xff]  ;;  %1304 = vmatpush.msra.mxu3 %v692_v17 }
  0x1a   : > { %v238_v13 = vld [vmem:[%s1687_s11 + $0x60] sm:$0xff]  ;;  %v239_v15 = vld [vmem:[%s1687_s11 + $0x68] sm:$0xff]  ;;  %699 = vmatpush.msra.mxu1 %v691_v18  ;;  %v240_v20 = vld [vmem:[%s1687_s11 + $0x70] sm:$0xff]  ;;  %p1554_p12 = pnand %p1553_p11, %p1670_p5  ;;  %p1559_p2 = por %p1558_p1, %p1557_p0 }
  0x1b   : > { %1305 = vmatpush.msra.mxu3 %v691_v18  ;;  %v686_v24 = vld [vmem:[%s2011_s2 + $0x38] sm:$0xff]  ;;  %v685_v26 = vld [vmem:[%s2011_s2 + $0x30] sm:$0xff]  ;;  %v1753_v27 = vld [vmem:[%s2013_s4] sm:$0x7] }
  0x1c   : > { %700 = vmatpush.msra.mxu1 %v690_v19  ;;  %v241_v25 = vld [vmem:[%s1687_s11 + $0x78] sm:$0xff]  ;;  %v684_v28 = vld [vmem:[%s2011_s2 + $0x28] sm:$0xff]  ;;  %v683_v29 = vld [vmem:[%s2011_s2 + $0x20] sm:$0xff]  ;;  %v1763_v30 = vperm.slane %v1753_v27, 0  ;;  %p1555_p13 = pneg %p1554_p12 }
  0x1d   : > { %1306 = vmatpush.msra.mxu3 %v690_v19  ;;  %v682_v31 = vld [vmem:[%s2011_s2 + $0x18] sm:$0xff]  ;;  %v681_v33 = vld [vmem:[%s2011_s2 + $0x10] sm:$0xff]  ;;  %v680_v35 = vld [vmem:[%s2011_s2 + $0x8] sm:$0xff] }
  0x1e   : > { %701 = vmatpush.msra.mxu1 %v689_v21  ;;  %v679_v37 = vld [vmem:[%s2011_s2] sm:$0xff]  ;;  %p1560_p3 = pnand %p1559_p2, %p1555_p13 }
  0x1f   : > { %1265 = vmatmul.msk.f32.gmra.mxu0 %vm245_vm0, %v227_v2  ;;  %1307 = vmatpush.msra.mxu3 %v689_v21 }
  0x20   : > { %702 = vmatpush.msra.mxu1 %v688_v22 }
  0x21   : > { %1308 = vmatpush.msra.mxu3 %v688_v22 }
  0x22   : > { %703 = vmatpush.msra.mxu1 %v687_v23 }
  0x23   : > { %1309 = vmatpush.msra.mxu3 %v687_v23 }
  0x24   : > { %704 = vmatpush.msra.mxu1 %v686_v24 }
  0x25   : > { %1310 = vmatpush.msra.mxu3 %v686_v24 }
  0x26   : > { %705 = vmatpush.msra.mxu1 %v685_v26 }
  0x27   : > { %1266 = vmatmul.msk.f32.gmra.mxu0 %vm245_vm0, %v228_v3  ;;  %1311 = vmatpush.msra.mxu3 %v685_v26 }
  0x28   : > { %706 = vmatpush.msra.mxu1 %v684_v28 }
  0x29   : > { %1312 = vmatpush.msra.mxu3 %v684_v28 }
  0x2a   : > { %707 = vmatpush.msra.mxu1 %v683_v29 }
  0x2b   : > { %1313 = vmatpush.msra.mxu3 %v683_v29 }
  0x2c   : > { %708 = vmatpush.msra.mxu1 %v682_v31 }
  0x2d   : > { %1314 = vmatpush.msra.mxu3 %v682_v31 }
  0x2e   : > { %709 = vmatpush.msra.mxu1 %v681_v33 }
  0x2f   : > { %1267 = vmatmul.msk.f32.gmra.mxu0 %vm245_vm0, %v229_v4  ;;  %1315 = vmatpush.msra.mxu3 %v681_v33 }
  0x30   : > { %710 = vmatpush.msra.mxu1 %v680_v35 }
  0x31   : > { %1316 = vmatpush.msra.mxu3 %v680_v35 }
  0x32   : > { %711 = vmatpush.msra.mxu1 %v679_v37 }
  0x33   : > { %1317 = vmatpush.msra.mxu3 %v679_v37 }
  0x37   : > { %1268 = vmatmul.msk.f32.gmra.mxu0 %vm245_vm0, %v230_v5 }
  0x3f   : > { %1269 = vmatmul.msk.f32.gmra.mxu0 %vm245_vm0, %v231_v6 }
  0x47   : > { %1270 = vmatmul.msk.f32.gmra.mxu0 %vm245_vm0, %v232_v7 }
  0x4f   : > { %1271 = vmatmul.msk.f32.gmra.mxu0 %vm245_vm0, %v233_v8 }
  0x57   : > { %1272 = vmatmul.msk.f32.gmra.mxu0 %vm245_vm0, %v234_v9 }
  0x5f   : > { %1273 = vmatmul.msk.f32.gmra.mxu0 %vm245_vm0, %v235_v10 }
  0x67   : > { %1274 = vmatmul.msk.f32.gmra.mxu0 %vm245_vm0, %v236_v11 }
  0x6f   : > { %1275 = vmatmul.msk.f32.gmra.mxu0 %vm245_vm0, %v237_v12 }
  0x77   : > { %1276 = vmatmul.msk.f32.gmra.mxu0 %vm245_vm0, %v238_v13 }
  0x7f   : > { %1277 = vmatmul.msk.f32.gmra.mxu0 %vm245_vm0, %v239_v15 }
  0x87   : > { %1278 = vmatmul.msk.f32.gmra.mxu0 %vm245_vm0, %v240_v20 }
  0x8f   : > { %1279 = vmatmul.msk.f32.gmra.mxu0 %vm245_vm0, %v241_v25 }
  0x94   : > { %v311_v32 = vpop.f32.mrf.mxu0 }
  0x95   : > { %v312_v34 = vadd.f32 %v311_v32, %v1763_v30 }
  0x97   : > { %v1280_v36 = vmul.f32 -1.442695, %v312_v34 }
  0x99   : > { %1375 = vpow2.f32 %v1280_v36 }
  0x9c   : > { %v314_v38 = vpop.f32.mrf.mxu0 }
  0x9d   : > { %v315_v39 = vadd.f32 %v314_v38, %v1763_v30 }
  0x9f   : > { %v1376_v40 = vpop.eup %1375  ;;  %v1281_v41 = vmul.f32 -1.442695, %v315_v39 }
  0xa0   : > { %v407_v42 = vadd.f32 1.0, %v1376_v40 }
  0xa1   : > { %1377 = vpow2.f32 %v1281_v41 }
  0xa2   : > { %1379 = vrcp.f32 %v407_v42  ;;  %v434_v52 = vand.u32 2147483648, %v407_v42  ;;  %v432_v55 = vand.u32 2147483647, %v407_v42  ;;  %vm428_vm2 = vweird.f32 %v407_v42 }
  0xa4   : > { %v317_v43 = vpop.f32.mrf.mxu0  ;;  %v435_v61 = vor.u32 1.1754944e-38, %v434_v52  ;;  %vm433_vm4 = vcmp.eq.f32.partialorder %v432_v55, 8.507059e+37 }
  0xa5   : > { %v318_v44 = vadd.f32 %v317_v43, %v1763_v30 }
  0xa7   : > { %v1378_v45 = vpop.eup %1377  ;;  %v1282_v46 = vmul.f32 -1.442695, %v318_v44 }
  0xa8   : > { %v1380_v47 = vpop.eup %1379  ;;  %v408_v48 = vadd.f32 1.0, %v1378_v45 }
  0xa9   : > { %v424_v49 = vmul.f32 %v1380_v47, %v407_v42  ;;  %1381 = vpow2.f32 %v1282_v46  ;;  %vm429_vm1 = vweird.f32 %v1380_v47 }
  0xaa   : > { %1383 = vrcp.f32 %v408_v48  ;;  %vm430_vm3 = vmor %vm428_vm2, %vm429_vm1  ;;  %v449_v3 = vand.u32 2147483648, %v408_v48  ;;  %v447_v6 = vand.u32 2147483647, %v408_v48  ;;  %vm443_vm6 = vweird.f32 %v408_v48 }
  0xab   : > { %v425_v50 = vsub.f32 1.0, %v424_v49 }
  0xac   : > { %v320_v51 = vpop.f32.mrf.mxu0  ;;  %v450_v12 = vor.u32 1.1754944e-38, %v449_v3  ;;  %vm448_vm8 = vcmp.eq.f32.partialorder %v447_v6, 8.507059e+37 }
  0xad   : > { %v321_v53 = vadd.f32 %v320_v51, %v1763_v30  ;;  %v426_v54 = vmul.f32 %v1380_v47, %v425_v50 }
  0xaf   : > { %v1382_v56 = vpop.eup %1381  ;;  %v1283_v57 = vmul.f32 -1.442695, %v321_v53  ;;  %v427_v58 = vadd.f32 %v1380_v47, %v426_v54 }
  0xb0   : > { %v1384_v59 = vpop.eup %1383  ;;  %v409_v60 = vadd.f32 1.0, %v1382_v56 }
  0xb1   : > { %v439_v62 = vmul.f32 %v1384_v59, %v408_v48  ;;  %1385 = vpow2.f32 %v1283_v57  ;;  %v431_v63 = vsel %vm430_vm3, %v1380_v47, %v427_v58  ;;  %vm444_vm5 = vweird.f32 %v1384_v59 }
  0xb2   : > { %1387 = vrcp.f32 %v409_v60  ;;  %v436_v0 = vsel %vm433_vm4, %v435_v61, %v431_v63  ;;  %vm445_vm7 = vmor %vm443_vm6, %vm444_vm5  ;;  %v464_v19 = vand.u32 2147483648, %v409_v60  ;;  %v462_v22 = vand.u32 2147483647, %v409_v60 }
  0xb3   : > { %v440_v1 = vsub.f32 1.0, %v439_v62  ;;  %1389 = vtanh.f32 %v436_v0  ;;  %vm458_vm10 = vweird.f32 %v409_v60 }
  0xb4   : > { %v323_v2 = vpop.f32.mrf.mxu0  ;;  %v465_v29 = vor.u32 1.1754944e-38, %v464_v19  ;;  %vm463_vm12 = vcmp.eq.f32.partialorder %v462_v22, 8.507059e+37 }
  0xb5   : > { %v324_v4 = vadd.f32 %v323_v2, %v1763_v30  ;;  %v441_v5 = vmul.f32 %v1384_v59, %v440_v1 }
  0xb7   : > { %v1386_v7 = vpop.eup %1385  ;;  %v1284_v8 = vmul.f32 -1.442695, %v324_v4  ;;  %v442_v9 = vadd.f32 %v1384_v59, %v441_v5 }
  0xb8   : > { %v1388_v10 = vpop.eup %1387  ;;  %v410_v11 = vadd.f32 1.0, %v1386_v7 }
  0xb9   : > { %v1390_v13 = vpop.eup %1389  ;;  %v454_v14 = vmul.f32 %v1388_v10, %v409_v60  ;;  %1391 = vpow2.f32 %v1284_v8  ;;  %v446_v15 = vsel %vm445_vm7, %v1384_v59, %v442_v9  ;;  %vm459_vm9 = vweird.f32 %v1388_v10 }
  0xba   : > { %1393 = vrcp.f32 %v410_v11  ;;  %712 = vmatmul.f32.vlgmr.msra.gmra.mxu1 %v1390_v13  ;;  %v451_v16 = vsel %vm448_vm8, %v450_v12, %v446_v15  ;;  %vm460_vm11 = vmor %vm458_vm10, %vm459_vm9  ;;  %v479_v37 = vand.u32 2147483648, %v410_v11  ;;  %v477_v40 = vand.u32 2147483647, %v410_v11 }
  0xbb   : > { %v455_v17 = vsub.f32 1.0, %v454_v14  ;;  %1395 = vtanh.f32 %v451_v16  ;;  %vm473_vm14 = vweird.f32 %v410_v11 }
  0xbc   : > { %v326_v18 = vpop.f32.mrf.mxu0  ;;  %v480_v46 = vor.u32 1.1754944e-38, %v479_v37  ;;  %vm478_vm0 = vcmp.eq.f32.partialorder %v477_v40, 8.507059e+37 }
  0xbd   : > { %v327_v20 = vadd.f32 %v326_v18, %v1763_v30  ;;  %v456_v21 = vmul.f32 %v1388_v10, %v455_v17 }
  0xbf   : > { %v1392_v23 = vpop.eup %1391  ;;  %v1285_v24 = vmul.f32 -1.442695, %v327_v20  ;;  %v457_v25 = vadd.f32 %v1388_v10, %v456_v21 }
  0xc0   : > { %v1394_v26 = vpop.eup %1393  ;;  %v411_v28 = vadd.f32 1.0, %v1392_v23 }
  0xc1   : > { %v1396_v31 = vpop.eup %1395  ;;  %v469_v32 = vmul.f32 %v1394_v26, %v410_v11  ;;  %1397 = vpow2.f32 %v1285_v24  ;;  %v461_v33 = vsel %vm460_vm11, %v1388_v10, %v457_v25  ;;  %vm474_vm13 = vweird.f32 %v1394_v26 }
  0xc2   : > { %1399 = vrcp.f32 %v411_v28  ;;  %715 = vmatmul.f32.gmra.mxu1 %v1396_v31  ;;  %v466_v34 = vsel %vm463_vm12, %v465_v29, %v461_v33  ;;  %vm475_vm15 = vmor %vm473_vm14, %vm474_vm13  ;;  %v494_v53 = vand.u32 2147483648, %v411_v28  ;;  %v492_v56 = vand.u32 2147483647, %v411_v28 }
  0xc3   : > { %v470_v35 = vsub.f32 1.0, %v469_v32  ;;  %1401 = vtanh.f32 %v466_v34  ;;  %vm488_vm2 = vweird.f32 %v411_v28 }
  0xc4   : > { %v329_v36 = vpop.f32.mrf.mxu0  ;;  %v495_v62 = vor.u32 1.1754944e-38, %v494_v53  ;;  %vm493_vm4 = vcmp.eq.f32.partialorder %v492_v56, 8.507059e+37 }
  0xc5   : > { %v330_v38 = vadd.f32 %v329_v36, %v1763_v30  ;;  %v471_v39 = vmul.f32 %v1394_v26, %v470_v35 }
  0xc7   : > { %v1398_v41 = vpop.eup %1397  ;;  %v1286_v42 = vmul.f32 -1.442695, %v330_v38  ;;  %v472_v43 = vadd.f32 %v1394_v26, %v471_v39 }
  0xc8   : > { %v1400_v44 = vpop.eup %1399  ;;  %v412_v45 = vadd.f32 1.0, %v1398_v41 }
  0xc9   : > { %v1402_v47 = vpop.eup %1401  ;;  %v484_v48 = vmul.f32 %v1400_v44, %v411_v28  ;;  %1403 = vpow2.f32 %v1286_v42  ;;  %v476_v49 = vsel %vm475_vm15, %v1394_v26, %v472_v43  ;;  %vm489_vm1 = vweird.f32 %v1400_v44 }
  0xca   : > { %1405 = vrcp.f32 %v412_v45  ;;  %718 = vmatmul.f32.gmra.mxu1 %v1402_v47  ;;  %v481_v50 = vsel %vm478_vm0, %v480_v46, %v476_v49  ;;  %vm490_vm3 = vmor %vm488_vm2, %vm489_vm1  ;;  %v509_v5 = vand.u32 2147483648, %v412_v45  ;;  %v507_v8 = vand.u32 2147483647, %v412_v45 }
  0xcb   : > { %v485_v51 = vsub.f32 1.0, %v484_v48  ;;  %1407 = vtanh.f32 %v481_v50  ;;  %vm503_vm6 = vweird.f32 %v412_v45 }
  0xcc   : > { %v332_v52 = vpop.f32.mrf.mxu0  ;;  %v510_v14 = vor.u32 1.1754944e-38, %v509_v5  ;;  %vm508_vm8 = vcmp.eq.f32.partialorder %v507_v8, 8.507059e+37 }
  0xcd   : > { %v333_v54 = vadd.f32 %v332_v52, %v1763_v30  ;;  %v486_v55 = vmul.f32 %v1400_v44, %v485_v51 }
  0xcf   : > { %v1404_v57 = vpop.eup %1403  ;;  %v1287_v58 = vmul.f32 -1.442695, %v333_v54  ;;  %v487_v59 = vadd.f32 %v1400_v44, %v486_v55 }
  0xd0   : > { %v1406_v60 = vpop.eup %1405  ;;  %v413_v61 = vadd.f32 1.0, %v1404_v57 }
  0xd1   : > { %v1408_v63 = vpop.eup %1407  ;;  %v499_v0 = vmul.f32 %v1406_v60, %v412_v45  ;;  %1409 = vpow2.f32 %v1287_v58  ;;  %v491_v1 = vsel %vm490_vm3, %v1400_v44, %v487_v59  ;;  %vm504_vm5 = vweird.f32 %v1406_v60 }
  0xd2   : > { %1411 = vrcp.f32 %v413_v61  ;;  %721 = vmatmul.f32.gmra.mxu1 %v1408_v63  ;;  %v496_v2 = vsel %vm493_vm4, %v495_v62, %v491_v1  ;;  %vm505_vm7 = vmor %vm503_vm6, %vm504_vm5  ;;  %v524_v21 = vand.u32 2147483648, %v413_v61  ;;  %v522_v24 = vand.u32 2147483647, %v413_v61 }
  0xd3   : > { %v500_v3 = vsub.f32 1.0, %v499_v0  ;;  %1413 = vtanh.f32 %v496_v2  ;;  %vm518_vm10 = vweird.f32 %v413_v61 }
  0xd4   : > { %v335_v4 = vpop.f32.mrf.mxu0  ;;  %v525_v32 = vor.u32 1.1754944e-38, %v524_v21  ;;  %vm523_vm12 = vcmp.eq.f32.partialorder %v522_v24, 8.507059e+37 }
  0xd5   : > { %v336_v6 = vadd.f32 %v335_v4, %v1763_v30  ;;  %v501_v7 = vmul.f32 %v1406_v60, %v500_v3 }
  0xd7   : > { %v1410_v9 = vpop.eup %1409  ;;  %v1288_v10 = vmul.f32 -1.442695, %v336_v6  ;;  %v502_v11 = vadd.f32 %v1406_v60, %v501_v7 }
  0xd8   : > { %v1412_v12 = vpop.eup %1411  ;;  %v414_v13 = vadd.f32 1.0, %v1410_v9 }
  0xd9   : > { %v1414_v15 = vpop.eup %1413  ;;  %v514_v16 = vmul.f32 %v1412_v12, %v413_v61  ;;  %1415 = vpow2.f32 %v1288_v10  ;;  %v506_v17 = vsel %vm505_vm7, %v1406_v60, %v502_v11  ;;  %vm519_vm9 = vweird.f32 %v1412_v12 }
  0xda   : > { %1417 = vrcp.f32 %v414_v13  ;;  %724 = vmatmul.f32.gmra.mxu1 %v1414_v15  ;;  %v511_v18 = vsel %vm508_vm8, %v510_v14, %v506_v17  ;;  %vm520_vm11 = vmor %vm518_vm10, %vm519_vm9  ;;  %v539_v39 = vand.u32 2147483648, %v414_v13  ;;  %v537_v42 = vand.u32 2147483647, %v414_v13 }
  0xdb   : > { %v515_v19 = vsub.f32 1.0, %v514_v16  ;;  %1419 = vtanh.f32 %v511_v18  ;;  %vm533_vm14 = vweird.f32 %v414_v13 }
  0xdc   : > { %v338_v20 = vpop.f32.mrf.mxu0  ;;  %v540_v48 = vor.u32 1.1754944e-38, %v539_v39  ;;  %vm538_vm0 = vcmp.eq.f32.partialorder %v537_v42, 8.507059e+37 }
  0xdd   : > { %v339_v22 = vadd.f32 %v338_v20, %v1763_v30  ;;  %v516_v23 = vmul.f32 %v1412_v12, %v515_v19 }
  0xdf   : > { %v1416_v25 = vpop.eup %1415  ;;  %v1289_v26 = vmul.f32 -1.442695, %v339_v22  ;;  %v517_v28 = vadd.f32 %v1412_v12, %v516_v23 }
  0xe0   : > { %v1418_v29 = vpop.eup %1417  ;;  %v415_v31 = vadd.f32 1.0, %v1416_v25 }
  0xe1   : > { %v1420_v33 = vpop.eup %1419  ;;  %v529_v34 = vmul.f32 %v1418_v29, %v414_v13  ;;  %1421 = vpow2.f32 %v1289_v26  ;;  %v521_v35 = vsel %vm520_vm11, %v1412_v12, %v517_v28  ;;  %vm534_vm13 = vweird.f32 %v1418_v29 }
  0xe2   : > { %1423 = vrcp.f32 %v415_v31  ;;  %727 = vmatmul.f32.gmra.mxu1 %v1420_v33  ;;  %v526_v36 = vsel %vm523_vm12, %v525_v32, %v521_v35  ;;  %vm535_vm15 = vmor %vm533_vm14, %vm534_vm13  ;;  %v554_v55 = vand.u32 2147483648, %v415_v31  ;;  %v552_v58 = vand.u32 2147483647, %v415_v31 }
  0xe3   : > { %v530_v37 = vsub.f32 1.0, %v529_v34  ;;  %1425 = vtanh.f32 %v526_v36  ;;  %vm548_vm2 = vweird.f32 %v415_v31 }
  0xe4   : > { %v341_v38 = vpop.f32.mrf.mxu0  ;;  %v555_v0 = vor.u32 1.1754944e-38, %v554_v55  ;;  %vm553_vm4 = vcmp.eq.f32.partialorder %v552_v58, 8.507059e+37 }
  0xe5   : > { %v342_v40 = vadd.f32 %v341_v38, %v1763_v30  ;;  %v531_v41 = vmul.f32 %v1418_v29, %v530_v37 }
  0xe7   : > { %v1422_v43 = vpop.eup %1421  ;;  %v1290_v44 = vmul.f32 -1.442695, %v342_v40  ;;  %v532_v45 = vadd.f32 %v1418_v29, %v531_v41 }
  0xe8   : > { %v1424_v46 = vpop.eup %1423  ;;  %v416_v47 = vadd.f32 1.0, %v1422_v43 }
  0xe9   : > { %v1426_v49 = vpop.eup %1425  ;;  %v544_v50 = vmul.f32 %v1424_v46, %v415_v31  ;;  %1427 = vpow2.f32 %v1290_v44  ;;  %v536_v51 = vsel %vm535_vm15, %v1418_v29, %v532_v45  ;;  %vm549_vm1 = vweird.f32 %v1424_v46 }
  0xea   : > { %1429 = vrcp.f32 %v416_v47  ;;  %730 = vmatmul.f32.gmra.mxu1 %v1426_v49  ;;  %v541_v52 = vsel %vm538_vm0, %v540_v48, %v536_v51  ;;  %vm550_vm3 = vmor %vm548_vm2, %vm549_vm1  ;;  %v569_v7 = vand.u32 2147483648, %v416_v47  ;;  %v567_v10 = vand.u32 2147483647, %v416_v47 }
  0xeb   : > { %v545_v53 = vsub.f32 1.0, %v544_v50  ;;  %1431 = vtanh.f32 %v541_v52  ;;  %vm563_vm6 = vweird.f32 %v416_v47 }
  0xec   : > { %v344_v54 = vpop.f32.mrf.mxu0  ;;  %v570_v16 = vor.u32 1.1754944e-38, %v569_v7  ;;  %vm568_vm8 = vcmp.eq.f32.partialorder %v567_v10, 8.507059e+37 }
  0xed   : > { %v345_v56 = vadd.f32 %v344_v54, %v1763_v30  ;;  %v546_v57 = vmul.f32 %v1424_v46, %v545_v53 }
  0xef   : > { %v1428_v59 = vpop.eup %1427  ;;  %v1291_v60 = vmul.f32 -1.442695, %v345_v56  ;;  %v547_v61 = vadd.f32 %v1424_v46, %v546_v57 }
  0xf0   : > { %v1430_v62 = vpop.eup %1429  ;;  %v417_v63 = vadd.f32 1.0, %v1428_v59 }
  0xf1   : > { %v1432_v1 = vpop.eup %1431  ;;  %v559_v2 = vmul.f32 %v1430_v62, %v416_v47  ;;  %1433 = vpow2.f32 %v1291_v60  ;;  %v551_v3 = vsel %vm550_vm3, %v1424_v46, %v547_v61  ;;  %vm564_vm5 = vweird.f32 %v1430_v62 }
  0xf2   : > { %1435 = vrcp.f32 %v417_v63  ;;  %733 = vmatmul.f32.gmra.mxu1 %v1432_v1  ;;  %v556_v4 = vsel %vm553_vm4, %v555_v0, %v551_v3  ;;  %vm565_vm7 = vmor %vm563_vm6, %vm564_vm5  ;;  %v584_v23 = vand.u32 2147483648, %v417_v63  ;;  %v582_v26 = vand.u32 2147483647, %v417_v63 }
  0xf3   : > { %v560_v5 = vsub.f32 1.0, %v559_v2  ;;  %1437 = vtanh.f32 %v556_v4  ;;  %vm578_vm10 = vweird.f32 %v417_v63 }
  0xf4   : > { %v347_v6 = vpop.f32.mrf.mxu0  ;;  %v585_v34 = vor.u32 1.1754944e-38, %v584_v23  ;;  %vm583_vm12 = vcmp.eq.f32.partialorder %v582_v26, 8.507059e+37  ;;  %v1094_v26 = vld [vmem:[%s2012_s3 + $0x68] sm:$0xff] }
  0xf5   : > { %v348_v8 = vadd.f32 %v347_v6, %v1763_v30  ;;  %v561_v9 = vmul.f32 %v1430_v62, %v560_v5 }
  0xf7   : > { %v1434_v11 = vpop.eup %1433  ;;  %v1292_v12 = vmul.f32 -1.442695, %v348_v8  ;;  %v562_v13 = vadd.f32 %v1430_v62, %v561_v9 }
  0xf8   : > { %v1436_v14 = vpop.eup %1435  ;;  %v418_v15 = vadd.f32 1.0, %v1434_v11 }
  0xf9   : > { %v1438_v17 = vpop.eup %1437  ;;  %v574_v18 = vmul.f32 %v1436_v14, %v417_v63  ;;  %1439 = vpow2.f32 %v1292_v12  ;;  %v566_v19 = vsel %vm565_vm7, %v1430_v62, %v562_v13  ;;  %vm579_vm9 = vweird.f32 %v1436_v14 }
  0xfa   : > { %1441 = vrcp.f32 %v418_v15  ;;  %736 = vmatmul.f32.gmra.mxu1 %v1438_v17  ;;  %v571_v20 = vsel %vm568_vm8, %v570_v16, %v566_v19  ;;  %vm580_vm11 = vmor %vm578_vm10, %vm579_vm9  ;;  %v599_v41 = vand.u32 2147483648, %v418_v15  ;;  %v597_v44 = vand.u32 2147483647, %v418_v15 }
  0xfb   : > { %v575_v21 = vsub.f32 1.0, %v574_v18  ;;  %1443 = vtanh.f32 %v571_v20  ;;  %vm593_vm14 = vweird.f32 %v418_v15  ;;  %v1096_v20 = vld [vmem:[%s2012_s3 + $0x78] sm:$0xff] }
  0xfc   : > { %v350_v22 = vpop.f32.mrf.mxu0  ;;  %v600_v50 = vor.u32 1.1754944e-38, %v599_v41  ;;  %vm598_vm0 = vcmp.eq.f32.partialorder %v597_v44, 8.507059e+37  ;;  %1098 = vmatpush.msra.mxu2 %v1096_v20  ;;  %1318 = vmatpush.msrb.mxu3 %v1096_v20  ;;  %v1091_v41 = vld [vmem:[%s2012_s3 + $0x50] sm:$0xff] }
  0xfd   : > { %v351_v24 = vadd.f32 %v350_v22, %v1763_v30  ;;  %v576_v25 = vmul.f32 %v1436_v14, %v575_v21 }
  0xff   : > { %v1440_v28 = vpop.eup %1439  ;;  %v1293_v29 = vmul.f32 -1.442695, %v351_v24  ;;  %v577_v31 = vadd.f32 %v1436_v14, %v576_v25  ;;  %v1095_v24 = vld [vmem:[%s2012_s3 + $0x70] sm:$0xff] }
 0x100   : > { %v1442_v32 = vpop.eup %1441  ;;  %v419_v33 = vadd.f32 1.0, %v1440_v28  ;;  %1099 = vmatpush.msra.mxu2 %v1095_v24  ;;  %1319 = vmatpush.msrb.mxu3 %v1095_v24 }
 0x101   : > { %v1444_v35 = vpop.eup %1443  ;;  %v589_v36 = vmul.f32 %v1442_v32, %v418_v15  ;;  %1445 = vpow2.f32 %v1293_v29  ;;  %v581_v37 = vsel %vm580_vm11, %v1436_v14, %v577_v31  ;;  %vm594_vm13 = vweird.f32 %v1442_v32 }
 0x102   : > { %1447 = vrcp.f32 %v419_v33  ;;  %739 = vmatmul.f32.gmra.mxu1 %v1444_v35  ;;  %v586_v38 = vsel %vm583_vm12, %v585_v34, %v581_v37  ;;  %vm595_vm15 = vmor %vm593_vm14, %vm594_vm13  ;;  %v614_v57 = vand.u32 2147483648, %v419_v33  ;;  %v612_v60 = vand.u32 2147483647, %v419_v33  ;;  %1100 = vmatpush.msra.mxu2 %v1094_v26  ;;  %v1093_v34 = vld [vmem:[%s2012_s3 + $0x60] sm:$0xff]  ;;  %v1092_v37 = vld [vmem:[%s2012_s3 + $0x58] sm:$0xff] }
 0x103   : > { %v590_v39 = vsub.f32 1.0, %v589_v36  ;;  %1449 = vtanh.f32 %v586_v38  ;;  %vm608_vm2 = vweird.f32 %v419_v33  ;;  %1320 = vmatpush.msrb.mxu3 %v1094_v26 }
 0x104   : > { %v353_v40 = vpop.f32.mrf.mxu0  ;;  %v615_v2 = vor.u32 1.1754944e-38, %v614_v57  ;;  %vm613_vm4 = vcmp.eq.f32.partialorder %v612_v60, 8.507059e+37  ;;  %1101 = vmatpush.msra.mxu2 %v1093_v34 }
 0x105   : > { %v354_v42 = vadd.f32 %v353_v40, %v1763_v30  ;;  %v591_v43 = vmul.f32 %v1442_v32, %v590_v39  ;;  %1321 = vmatpush.msrb.mxu3 %v1093_v34 }
 0x106   : > { %1102 = vmatpush.msra.mxu2 %v1092_v37 }
 0x107   : > { %v1446_v45 = vpop.eup %1445  ;;  %v1294_v46 = vmul.f32 -1.442695, %v354_v42  ;;  %v592_v47 = vadd.f32 %v1442_v32, %v591_v43  ;;  %1322 = vmatpush.msrb.mxu3 %v1092_v37  ;;  %v1090_v43 = vld [vmem:[%s2012_s3 + $0x48] sm:$0xff] }
 0x108   : > { %v1448_v48 = vpop.eup %1447  ;;  %v420_v49 = vadd.f32 1.0, %v1446_v45  ;;  %1103 = vmatpush.msra.mxu2 %v1091_v41 }
 0x109   : > { %v1450_v51 = vpop.eup %1449  ;;  %v604_v52 = vmul.f32 %v1448_v48, %v419_v33  ;;  %1451 = vpow2.f32 %v1294_v46  ;;  %v596_v53 = vsel %vm595_vm15, %v1442_v32, %v592_v47  ;;  %vm609_vm1 = vweird.f32 %v1448_v48  ;;  %1323 = vmatpush.msrb.mxu3 %v1091_v41  ;;  %v1089_v47 = vld [vmem:[%s2012_s3 + $0x40] sm:$0xff] }
 0x10a   : > { %1453 = vrcp.f32 %v420_v49  ;;  %742 = vmatmul.f32.gmra.mxu1 %v1450_v51  ;;  %v601_v54 = vsel %vm598_vm0, %v600_v50, %v596_v53  ;;  %vm610_vm3 = vmor %vm608_vm2, %vm609_vm1  ;;  %v629_v7 = vand.u32 2147483648, %v420_v49  ;;  %v627_v9 = vand.u32 2147483647, %v420_v49  ;;  %1104 = vmatpush.msra.mxu2 %v1090_v43  ;;  %v1087_v50 = vld [vmem:[%s2012_s3 + $0x30] sm:$0xff]  ;;  %v1086_v51 = vld [vmem:[%s2012_s3 + $0x28] sm:$0xff] }
 0x10b   : > { %v605_v55 = vsub.f32 1.0, %v604_v52  ;;  %1455 = vtanh.f32 %v601_v54  ;;  %vm623_vm6 = vweird.f32 %v420_v49  ;;  %1324 = vmatpush.msrb.mxu3 %v1090_v43  ;;  %v1085_v53 = vld [vmem:[%s2012_s3 + $0x20] sm:$0xff]  ;;  %v1084_v54 = vld [vmem:[%s2012_s3 + $0x18] sm:$0xff] }
 0x10c   : > { %v356_v56 = vpop.f32.mrf.mxu0  ;;  %v630_v14 = vor.u32 1.1754944e-38, %v629_v7  ;;  %vm628_vm8 = vcmp.eq.f32.partialorder %v627_v9, 8.507059e+37  ;;  %1105 = vmatpush.msra.mxu2 %v1089_v47 }
 0x10d   : > { %v357_v58 = vadd.f32 %v356_v56, %v1763_v30  ;;  %v606_v59 = vmul.f32 %v1448_v48, %v605_v55  ;;  %1325 = vmatpush.msrb.mxu3 %v1089_v47  ;;  %v1833_v55 = vperm.slane %v1753_v27, 1  ;;  %v1083_v56 = vld [vmem:[%s2012_s3 + $0x10] sm:$0xff]  ;;  %v1081_v27 = vld [vmem:[%s2012_s3] sm:$0xff] }
 0x10f   : > { %v1452_v61 = vpop.eup %1451  ;;  %v1295_v62 = vmul.f32 -1.442695, %v357_v58  ;;  %v607_v63 = vadd.f32 %v1448_v48, %v606_v59  ;;  %v1082_v58 = vld [vmem:[%s2012_s3 + $0x8] sm:$0xff] }
 0x110   : > { %v1454_v0 = vpop.eup %1453  ;;  %v421_v1 = vadd.f32 1.0, %v1452_v61 }
 0x111   : > { %v1456_v3 = vpop.eup %1455  ;;  %v619_v4 = vmul.f32 %v1454_v0, %v420_v49  ;;  %1457 = vpow2.f32 %v1295_v62  ;;  %v611_v5 = vsel %vm610_vm3, %v1448_v48, %v607_v63  ;;  %vm624_vm5 = vweird.f32 %v1454_v0  ;;  %v1088_v49 = vld [vmem:[%s2012_s3 + $0x38] sm:$0xff] }
 0x112   : > { %1459 = vrcp.f32 %v421_v1  ;;  %745 = vmatmul.f32.vlgmr.msra.gmra.mxu3 %v1456_v3  ;;  %v616_v6 = vsel %vm613_vm4, %v615_v2, %v611_v5  ;;  %vm625_vm7 = vmor %vm623_vm6, %vm624_vm5  ;;  %v644_v21 = vand.u32 2147483648, %v421_v1  ;;  %v642_v23 = vand.u32 2147483647, %v421_v1  ;;  %1106 = vmatpush.msra.mxu2 %v1088_v49 }
 0x113   : > { %v620_v30 = vsub.f32 1.0, %v619_v4  ;;  %1461 = vtanh.f32 %v616_v6  ;;  %vm638_vm10 = vweird.f32 %v421_v1  ;;  %1326 = vmatpush.msrb.mxu3 %v1088_v49 }
 0x114   : > { %v645_v29 = vor.u32 1.1754944e-38, %v644_v21  ;;  %vm643_vm12 = vcmp.eq.f32.partialorder %v642_v23, 8.507059e+37  ;;  %1107 = vmatpush.msra.mxu2 %v1087_v50 }
 0x115   : > { %v621_v8 = vmul.f32 %v1454_v0, %v620_v30  ;;  %1327 = vmatpush.msrb.mxu3 %v1087_v50 }
 0x116   : > { %1108 = vmatpush.msra.mxu2 %v1086_v51 }
 0x117   : > { %v1458_v10 = vpop.eup %1457  ;;  %v622_v11 = vadd.f32 %v1454_v0, %v621_v8  ;;  %1328 = vmatpush.msrb.mxu3 %v1086_v51 }
 0x118   : > { %v1460_v12 = vpop.eup %1459  ;;  %v422_v13 = vadd.f32 1.0, %v1458_v10  ;;  %1109 = vmatpush.msra.mxu2 %v1085_v53 }
 0x119   : > { %v1462_v15 = vpop.eup %1461  ;;  %v634_v16 = vmul.f32 %v1460_v12, %v421_v1  ;;  %v626_v17 = vsel %vm625_vm7, %v1454_v0, %v622_v11  ;;  %vm639_vm9 = vweird.f32 %v1460_v12  ;;  %1329 = vmatpush.msrb.mxu3 %v1085_v53 }
 0x11a   : > { %1463 = vrcp.f32 %v422_v13  ;;  %748 = vmatmul.f32.gmra.mxu3 %v1462_v15  ;;  %v631_v18 = vsel %vm628_vm8, %v630_v14, %v626_v17  ;;  %vm640_vm11 = vmor %vm638_vm10, %vm639_vm9  ;;  %v659_v38 = vand.u32 2147483648, %v422_v13  ;;  %v657_v40 = vand.u32 2147483647, %v422_v13  ;;  %1110 = vmatpush.msra.mxu2 %v1084_v54 }
 0x11b   : > { %v635_v19 = vsub.f32 1.0, %v634_v16  ;;  %1465 = vtanh.f32 %v631_v18  ;;  %vm653_vm14 = vweird.f32 %v422_v13  ;;  %1330 = vmatpush.msrb.mxu3 %v1084_v54 }
 0x11c   : > { %v660_v44 = vor.u32 1.1754944e-38, %v659_v38  ;;  %vm658_vm0 = vcmp.eq.f32.partialorder %v657_v40, 8.507059e+37  ;;  %1111 = vmatpush.msra.mxu2 %v1083_v56 }
 0x11d   : > { %v636_v22 = vmul.f32 %v1460_v12, %v635_v19  ;;  %1331 = vmatpush.msrb.mxu3 %v1083_v56 }
 0x11e   : > { %1112 = vmatpush.msra.mxu2 %v1082_v58 }
 0x11f   : > { %v637_v25 = vadd.f32 %v1460_v12, %v636_v22  ;;  %1332 = vmatpush.msrb.mxu3 %v1082_v58 }
 0x120   : > { %v1464_v28 = vpop.eup %1463  ;;  %1113 = vmatpush.msra.mxu2 %v1081_v27 }
 0x121   : > { %v1466_v31 = vpop.eup %1465  ;;  %v649_v32 = vmul.f32 %v1464_v28, %v422_v13  ;;  %v641_v33 = vsel %vm640_vm11, %v1460_v12, %v637_v25  ;;  %vm654_vm13 = vweird.f32 %v1464_v28  ;;  %1333 = vmatpush.msrb.mxu3 %v1081_v27 }
 0x122   : > { %751 = vmatmul.f32.gmra.mxu3 %v1466_v31  ;;  %v646_v35 = vsel %vm643_vm12, %v645_v29, %v641_v33  ;;  %vm655_vm15 = vmor %vm653_vm14, %vm654_vm13 }
 0x123   : > { %v650_v36 = vsub.f32 1.0, %v649_v32  ;;  %1467 = vtanh.f32 %v646_v35 }
 0x125   : > { %v651_v39 = vmul.f32 %v1464_v28, %v650_v36 }
 0x127   : > { %v652_v42 = vadd.f32 %v1464_v28, %v651_v39 }
 0x129   : > { %v1468_v45 = vpop.eup %1467  ;;  %v656_v46 = vsel %vm655_vm15, %v1464_v28, %v652_v42 }
 0x12a   : > { %754 = vmatmul.f32.gmra.mxu3 %v1468_v45  ;;  %v661_v48 = vsel %vm658_vm0, %v660_v44, %v656_v46 }
 0x12b   : > { %1469 = vtanh.f32 %v661_v48 }
 0x131   : > { %v1470_v52 = vpop.eup %1469 }
 0x132   : > { %757 = vmatmul.f32.gmra.mxu3 %v1470_v52 }
 0x137   : > { %v713_v57 = vpop.f32.mrf.mxu1 }
 0x138   : > { %v714_v59 = vadd.f32 %v713_v57, %v1833_v55 }
 0x13a   : > { %v761_v60 = vsub.f32 0.0, %v714_v59 }
 0x13c   : > { %v825_v61 = vand.u32 2147483647, %v761_v60  ;;  %v777_v25 = vmax.f32 %v761_v60, 0.0  ;;  %vm793_vm2 = vcmp.ne.f32.partialorder %v761_v60, %v761_v60 }
 0x13e   : > { %v841_v62 = vsub.f32 0.0, %v825_v61 }
 0x13f   : > { %v716_v63 = vpop.f32.mrf.mxu1 }
 0x140   : > { %v857_v0 = vmul.f32 1.442695, %v841_v62  ;;  %v717_v1 = vadd.f32 %v716_v63, %v1833_v55 }
 0x142   : > { %1471 = vpow2.f32 %v857_v0  ;;  %v762_v2 = vsub.f32 0.0, %v717_v1 }
 0x144   : > { %v826_v3 = vand.u32 2147483647, %v762_v2  ;;  %v778_v46 = vmax.f32 %v762_v2, 0.0  ;;  %vm794_vm4 = vcmp.ne.f32.partialorder %v762_v2, %v762_v2 }
 0x146   : > { %v842_v4 = vsub.f32 0.0, %v826_v3 }
 0x147   : > { %v719_v5 = vpop.f32.mrf.mxu1 }
 0x148   : > { %v1472_v6 = vpop.eup %1471  ;;  %v859_v30 = vmul.f32 1.442695, %v842_v4  ;;  %v720_v7 = vadd.f32 %v719_v5, %v1833_v55 }
 0x149   : > { %v889_v8 = vadd.f32 1.0, %v1472_v6  ;;  %v892_v10 = vmul.f32 -0.5, %v1472_v6  ;;  %v895_v15 = vand.u32 2147483647, %v1472_v6 }
 0x14a   : > { %1473 = vpow2.f32 %v859_v30  ;;  %v1847_v9 = vsub.f32 0.0, %v720_v7 }
 0x14b   : > { %1475 = vlog2.f32 %v889_v8  ;;  %v893_v13 = vadd.f32 1.0, %v892_v10  ;;  %vm896_vm1 = vcmp.lt.f32.partialorder %v895_v15, 0.0004427343 }
 0x14c   : > { %v827_v11 = vand.u32 2147483647, %v1847_v9  ;;  %v779_v1 = vmax.f32 %v1847_v9, 0.0  ;;  %vm795_vm6 = vcmp.ne.f32.partialorder %v1847_v9, %v1847_v9 }
 0x14d   : > { %v894_v24 = vmul.f32 %v1472_v6, %v893_v13 }
 0x14e   : > { %v843_v12 = vsub.f32 0.0, %v827_v11 }
 0x14f   : > { %v722_v14 = vpop.f32.mrf.mxu1 }
 0x150   : > { %v1474_v16 = vpop.eup %1473  ;;  %v861_v17 = vmul.f32 1.442695, %v843_v12  ;;  %v723_v18 = vadd.f32 %v722_v14, %v1833_v55 }
 0x151   : > { %v1476_v19 = vpop.eup %1475  ;;  %v898_v20 = vadd.f32 1.0, %v1474_v16  ;;  %v901_v21 = vmul.f32 -0.5, %v1474_v16  ;;  %v904_v35 = vand.u32 2147483647, %v1474_v16 }
 0x152   : > { %1477 = vpow2.f32 %v861_v17  ;;  %v1851_v22 = vsub.f32 0.0, %v723_v18  ;;  %v891_v23 = vmul.f32 0.6931472, %v1476_v19 }
 0x153   : > { %1479 = vlog2.f32 %v898_v20  ;;  %v902_v31 = vadd.f32 1.0, %v901_v21  ;;  %vm905_vm3 = vcmp.lt.f32.partialorder %v904_v35, 0.0004427343 }
 0x154   : > { %v828_v26 = vand.u32 2147483647, %v1851_v22  ;;  %v897_v28 = vsel %vm896_vm1, %v894_v24, %v891_v23  ;;  %v780_v20 = vmax.f32 %v1851_v22, 0.0  ;;  %vm796_vm8 = vcmp.ne.f32.partialorder %v1851_v22, %v1851_v22 }
 0x155   : > { %v1033_v29 = vadd.f32 %v897_v28, %v777_v25  ;;  %v903_v41 = vmul.f32 %v1474_v16, %v902_v31 }
 0x156   : > { %v844_v32 = vsub.f32 0.0, %v828_v26 }
 0x157   : > { %v725_v33 = vpop.f32.mrf.mxu1  ;;  %v1049_v34 = vsel %vm793_vm2, %v761_v60, %v1033_v29 }
 0x158   : > { %v1478_v36 = vpop.eup %1477  ;;  %v863_v37 = vmul.f32 1.442695, %v844_v32  ;;  %v726_v38 = vadd.f32 %v725_v33, %v1833_v55  ;;  %v1065_v39 = vsub.f32 0.0, %v1049_v34 }
 0x159   : > { %v1480_v40 = vpop.eup %1479  ;;  %v907_v42 = vadd.f32 1.0, %v1478_v36  ;;  %v910_v45 = vmul.f32 -0.5, %v1478_v36  ;;  %v913_v54 = vand.u32 2147483647, %v1478_v36 }
 0x15a   : > { %1481 = vpow2.f32 %v863_v37  ;;  %v1855_v43 = vsub.f32 0.0, %v726_v38  ;;  %1114 = vmatmul.f32.vlgmr.msra.gmra.mxu2 %v1065_v39  ;;  %v900_v44 = vmul.f32 0.6931472, %v1480_v40 }
 0x15b   : > { %1483 = vlog2.f32 %v907_v42  ;;  %v911_v51 = vadd.f32 1.0, %v910_v45  ;;  %vm914_vm5 = vcmp.lt.f32.partialorder %v913_v54, 0.0004427343 }
 0x15c   : > { %v829_v47 = vand.u32 2147483647, %v1855_v43  ;;  %v906_v48 = vsel %vm905_vm3, %v903_v41, %v900_v44  ;;  %v781_v41 = vmax.f32 %v1855_v43, 0.0  ;;  %vm797_vm10 = vcmp.ne.f32.partialorder %v1855_v43, %v1855_v43 }
 0x15d   : > { %v1034_v49 = vadd.f32 %v906_v48, %v778_v46  ;;  %v912_v0 = vmul.f32 %v1478_v36, %v911_v51 }
 0x15e   : > { %v845_v50 = vsub.f32 0.0, %v829_v47 }
 0x15f   : > { %v728_v52 = vpop.f32.mrf.mxu1  ;;  %v1050_v53 = vsel %vm794_vm4, %v762_v2, %v1034_v49 }
 0x160   : > { %v1482_v56 = vpop.eup %1481  ;;  %v865_v57 = vmul.f32 1.442695, %v845_v50  ;;  %v729_v58 = vadd.f32 %v728_v52, %v1833_v55  ;;  %v1066_v59 = vsub.f32 0.0, %v1050_v53 }
 0x161   : > { %v1484_v27 = vpop.eup %1483  ;;  %v916_v60 = vadd.f32 1.0, %v1482_v56  ;;  %v919_v61 = vmul.f32 -0.5, %v1482_v56  ;;  %v922_v8 = vand.u32 2147483647, %v1482_v56 }
 0x162   : > { %1485 = vpow2.f32 %v865_v57  ;;  %v1859_v62 = vsub.f32 0.0, %v729_v58  ;;  %1117 = vmatmul.f32.gmra.mxu2 %v1066_v59  ;;  %v909_v63 = vmul.f32 0.6931472, %v1484_v27 }
 0x163   : > { %1487 = vlog2.f32 %v916_v60  ;;  %v920_v5 = vadd.f32 1.0, %v919_v61  ;;  %vm923_vm7 = vcmp.lt.f32.partialorder %v922_v8, 0.0004427343 }
 0x164   : > { %v830_v2 = vand.u32 2147483647, %v1859_v62  ;;  %v915_v3 = vsel %vm914_vm5, %v912_v0, %v909_v63  ;;  %v782_v60 = vmax.f32 %v1859_v62, 0.0  ;;  %vm798_vm12 = vcmp.ne.f32.partialorder %v1859_v62, %v1859_v62 }
 0x165   : > { %v1035_v4 = vadd.f32 %v915_v3, %v779_v1  ;;  %v921_v15 = vmul.f32 %v1482_v56, %v920_v5 }
 0x166   : > { %v846_v6 = vsub.f32 0.0, %v830_v2 }
 0x167   : > { %v731_v30 = vpop.f32.mrf.mxu1  ;;  %v1051_v7 = vsel %vm795_vm6, %v1847_v9, %v1035_v4 }
 0x168   : > { %v1486_v10 = vpop.eup %1485  ;;  %v867_v11 = vmul.f32 1.442695, %v846_v6  ;;  %v732_v12 = vadd.f32 %v731_v30, %v1833_v55  ;;  %v1067_v13 = vsub.f32 0.0, %v1051_v7 }
 0x169   : > { %v1488_v14 = vpop.eup %1487  ;;  %v925_v16 = vadd.f32 1.0, %v1486_v10  ;;  %v928_v19 = vmul.f32 -0.5, %v1486_v10  ;;  %v931_v29 = vand.u32 2147483647, %v1486_v10 }
 0x16a   : > { %1489 = vpow2.f32 %v867_v11  ;;  %v1867_v17 = vsub.f32 0.0, %v732_v12  ;;  %1120 = vmatmul.f32.gmra.mxu2 %v1067_v13  ;;  %v918_v18 = vmul.f32 0.6931472, %v1488_v14 }
 0x16b   : > { %1491 = vlog2.f32 %v925_v16  ;;  %v929_v25 = vadd.f32 1.0, %v928_v19  ;;  %vm932_vm9 = vcmp.lt.f32.partialorder %v931_v29, 0.0004427343 }
 0x16c   : > { %v831_v9 = vand.u32 2147483647, %v1867_v17  ;;  %v924_v21 = vsel %vm923_vm7, %v921_v15, %v918_v18  ;;  %v783_v15 = vmax.f32 %v1867_v17, 0.0  ;;  %vm799_vm14 = vcmp.ne.f32.partialorder %v1867_v17, %v1867_v17 }
 0x16d   : > { %v1036_v23 = vadd.f32 %v924_v21, %v780_v20  ;;  %v930_v40 = vmul.f32 %v1486_v10, %v929_v25 }
 0x16e   : > { %v847_v24 = vsub.f32 0.0, %v831_v9 }
 0x16f   : > { %v734_v26 = vpop.f32.mrf.mxu1  ;;  %v1052_v28 = vsel %vm796_vm8, %v1851_v22, %v1036_v23 }
 0x170   : > { %v1490_v31 = vpop.eup %1489  ;;  %v869_v32 = vmul.f32 1.442695, %v847_v24  ;;  %v735_v33 = vadd.f32 %v734_v26, %v1833_v55  ;;  %v1068_v34 = vsub.f32 0.0, %v1052_v28 }
 0x171   : > { %v1492_v35 = vpop.eup %1491  ;;  %v934_v36 = vadd.f32 1.0, %v1490_v31  ;;  %v937_v37 = vmul.f32 -0.5, %v1490_v31  ;;  %v940_v49 = vand.u32 2147483647, %v1490_v31 }
 0x172   : > { %1493 = vpow2.f32 %v869_v32  ;;  %v1875_v38 = vsub.f32 0.0, %v735_v33  ;;  %1123 = vmatmul.f32.gmra.mxu2 %v1068_v34  ;;  %v927_v39 = vmul.f32 0.6931472, %v1492_v35 }
 0x173   : > { %1495 = vlog2.f32 %v934_v36  ;;  %v938_v45 = vadd.f32 1.0, %v937_v37  ;;  %vm941_vm11 = vcmp.lt.f32.partialorder %v940_v49, 0.0004427343 }
 0x174   : > { %v832_v22 = vand.u32 2147483647, %v1875_v38  ;;  %v933_v42 = vsel %vm932_vm9, %v930_v40, %v927_v39  ;;  %v784_v36 = vmax.f32 %v1875_v38, 0.0  ;;  %vm800_vm0 = vcmp.ne.f32.partialorder %v1875_v38, %v1875_v38 }
 0x175   : > { %v1037_v44 = vadd.f32 %v933_v42, %v781_v41  ;;  %v939_v56 = vmul.f32 %v1490_v31, %v938_v45 }
 0x176   : > { %v848_v46 = vsub.f32 0.0, %v832_v22 }
 0x177   : > { %v737_v47 = vpop.f32.mrf.mxu1  ;;  %v1053_v48 = vsel %vm797_vm10, %v1855_v43, %v1037_v44 }
 0x178   : > { %v1494_v50 = vpop.eup %1493  ;;  %v871_v51 = vmul.f32 1.442695, %v848_v46  ;;  %v738_v52 = vadd.f32 %v737_v47, %v1833_v55  ;;  %v1069_v53 = vsub.f32 0.0, %v1053_v48 }
 0x179   : > { %v1496_v54 = vpop.eup %1495  ;;  %v943_v57 = vadd.f32 1.0, %v1494_v50  ;;  %v946_v27 = vmul.f32 -0.5, %v1494_v50  ;;  %v949_v4 = vand.u32 2147483647, %v1494_v50 }
 0x17a   : > { %1497 = vpow2.f32 %v871_v51  ;;  %v1883_v58 = vsub.f32 0.0, %v738_v52  ;;  %1126 = vmatmul.f32.gmra.mxu2 %v1069_v53  ;;  %v936_v59 = vmul.f32 0.6931472, %v1496_v54 }
 0x17b   : > { %1499 = vlog2.f32 %v943_v57  ;;  %v947_v1 = vadd.f32 1.0, %v946_v27  ;;  %vm950_vm13 = vcmp.lt.f32.partialorder %v949_v4, 0.0004427343 }
 0x17c   : > { %v833_v43 = vand.u32 2147483647, %v1883_v58  ;;  %v942_v61 = vsel %vm941_vm11, %v939_v56, %v936_v59  ;;  %v785_v52 = vmax.f32 %v1883_v58, 0.0  ;;  %vm801_vm2 = vcmp.ne.f32.partialorder %v1883_v58, %v1883_v58 }
 0x17d   : > { %v1038_v63 = vadd.f32 %v942_v61, %v782_v60  ;;  %v948_v14 = vmul.f32 %v1494_v50, %v947_v1 }
 0x17e   : > { %v849_v0 = vsub.f32 0.0, %v833_v43 }
 0x17f   : > { %v740_v2 = vpop.f32.mrf.mxu1  ;;  %v1054_v3 = vsel %vm798_vm12, %v1859_v62, %v1038_v63 }
 0x180   : > { %v1498_v5 = vpop.eup %1497  ;;  %v873_v6 = vmul.f32 1.442695, %v849_v0  ;;  %v741_v30 = vadd.f32 %v740_v2, %v1833_v55  ;;  %v1070_v7 = vsub.f32 0.0, %v1054_v3 }
 0x181   : > { %v1500_v8 = vpop.eup %1499  ;;  %v952_v10 = vadd.f32 1.0, %v1498_v5  ;;  %v955_v11 = vmul.f32 -0.5, %v1498_v5  ;;  %v958_v23 = vand.u32 2147483647, %v1498_v5 }
 0x182   : > { %1501 = vpow2.f32 %v873_v6  ;;  %v1891_v12 = vsub.f32 0.0, %v741_v30  ;;  %1129 = vmatmul.f32.gmra.mxu2 %v1070_v7  ;;  %v945_v13 = vmul.f32 0.6931472, %v1500_v8 }
 0x183   : > { %1503 = vlog2.f32 %v952_v10  ;;  %v956_v19 = vadd.f32 1.0, %v955_v11  ;;  %vm959_vm15 = vcmp.lt.f32.partialorder %v958_v23, 0.0004427343 }
 0x184   : > { %v834_v62 = vand.u32 2147483647, %v1891_v12  ;;  %v951_v16 = vsel %vm950_vm13, %v948_v14, %v945_v13  ;;  %vm802_vm4 = vcmp.ne.f32.partialorder %v1891_v12, %v1891_v12 }
 0x185   : > { %v1039_v18 = vadd.f32 %v951_v16, %v783_v15  ;;  %v957_v31 = vmul.f32 %v1498_v5, %v956_v19  ;;  %v786_v5 = vmax.f32 %v1891_v12, 0.0 }
 0x186   : > { %v850_v20 = vsub.f32 0.0, %v834_v62 }
 0x187   : > { %v743_v9 = vpop.f32.mrf.mxu1  ;;  %v1055_v21 = vsel %vm799_vm14, %v1867_v17, %v1039_v18 }
 0x188   : > { %v1502_v24 = vpop.eup %1501  ;;  %v875_v25 = vmul.f32 1.442695, %v850_v20  ;;  %v744_v26 = vadd.f32 %v743_v9, %v1833_v55  ;;  %v1071_v28 = vsub.f32 0.0, %v1055_v21 }
 0x189   : > { %v1504_v29 = vpop.eup %1503  ;;  %v961_v32 = vadd.f32 1.0, %v1502_v24  ;;  %v964_v35 = vmul.f32 -0.5, %v1502_v24  ;;  %v967_v42 = vand.u32 2147483647, %v1502_v24 }
 0x18a   : > { %1505 = vpow2.f32 %v875_v25  ;;  %v1899_v33 = vsub.f32 0.0, %v744_v26  ;;  %1132 = vmatmul.f32.gmra.mxu2 %v1071_v28  ;;  %v954_v34 = vmul.f32 0.6931472, %v1504_v29 }
 0x18b   : > { %1507 = vlog2.f32 %v961_v32  ;;  %v965_v41 = vadd.f32 1.0, %v964_v35  ;;  %vm968_vm1 = vcmp.lt.f32.partialorder %v967_v42, 0.0004427343 }
 0x18c   : > { %v835_v17 = vand.u32 2147483647, %v1899_v33  ;;  %v960_v37 = vsel %vm959_vm15, %v957_v31, %v954_v34  ;;  %v787_v9 = vmax.f32 %v1899_v33, 0.0  ;;  %vm803_vm6 = vcmp.ne.f32.partialorder %v1899_v33, %v1899_v33 }
 0x18d   : > { %v1040_v39 = vadd.f32 %v960_v37, %v784_v36  ;;  %v966_v50 = vmul.f32 %v1502_v24, %v965_v41 }
 0x18e   : > { %v851_v40 = vsub.f32 0.0, %v835_v17 }
 0x18f   : > { %v1056_v22 = vsel %vm800_vm0, %v1875_v38, %v1040_v39 }
 0x190   : > { %v1506_v44 = vpop.eup %1505  ;;  %v877_v45 = vmul.f32 1.442695, %v851_v40  ;;  %v1072_v46 = vsub.f32 0.0, %v1056_v22 }
 0x191   : > { %v1508_v47 = vpop.eup %1507  ;;  %v970_v48 = vadd.f32 1.0, %v1506_v44  ;;  %v973_v51 = vmul.f32 -0.5, %v1506_v44  ;;  %v976_v27 = vand.u32 2147483647, %v1506_v44 }
 0x192   : > { %1509 = vpow2.f32 %v877_v45  ;;  %1135 = vmatmul.f32.gmra.mxu2 %v1072_v46  ;;  %v963_v49 = vmul.f32 0.6931472, %v1508_v47 }
 0x193   : > { %1511 = vlog2.f32 %v970_v48  ;;  %v974_v57 = vadd.f32 1.0, %v973_v51  ;;  %vm977_vm3 = vcmp.lt.f32.partialorder %v976_v27, 0.0004427343 }
 0x194   : > { %v969_v53 = vsel %vm968_vm1, %v966_v50, %v963_v49 }
 0x195   : > { %v746_v54 = vpop.f32.mrf.mxu3  ;;  %v1041_v56 = vadd.f32 %v969_v53, %v785_v52  ;;  %v975_v3 = vmul.f32 %v1506_v44, %v974_v57 }
 0x196   : > { %v747_v38 = vadd.f32 %v746_v54, %v1833_v55 }
 0x197   : > { %v1057_v59 = vsel %vm801_vm2, %v1883_v58, %v1041_v56 }
 0x198   : > { %v1510_v60 = vpop.eup %1509  ;;  %v1911_v43 = vsub.f32 0.0, %v747_v38  ;;  %v1073_v61 = vsub.f32 0.0, %v1057_v59 }
 0x199   : > { %v1512_v63 = vpop.eup %1511  ;;  %v979_v0 = vadd.f32 1.0, %v1510_v60  ;;  %v982_v4 = vmul.f32 -0.5, %v1510_v60  ;;  %v985_v14 = vand.u32 2147483647, %v1510_v60 }
 0x19a   : > { %v836_v1 = vand.u32 2147483647, %v1911_v43  ;;  %1138 = vmatmul.f32.gmra.mxu2 %v1073_v61  ;;  %v972_v2 = vmul.f32 0.6931472, %v1512_v63  ;;  %v788_v49 = vmax.f32 %v1911_v43, 0.0  ;;  %vm804_vm8 = vcmp.ne.f32.partialorder %v1911_v43, %v1911_v43 }
 0x19b   : > { %1513 = vlog2.f32 %v979_v0  ;;  %v983_v11 = vadd.f32 1.0, %v982_v4  ;;  %vm986_vm5 = vcmp.lt.f32.partialorder %v985_v14, 0.0004427343 }
 0x19c   : > { %v852_v6 = vsub.f32 0.0, %v836_v1  ;;  %v978_v30 = vsel %vm977_vm3, %v975_v3, %v972_v2 }
 0x19d   : > { %v749_v58 = vpop.f32.mrf.mxu3  ;;  %v1042_v7 = vadd.f32 %v978_v30, %v786_v5  ;;  %v984_v20 = vmul.f32 %v1510_v60, %v983_v11 }
 0x19e   : > { %v879_v8 = vmul.f32 1.442695, %v852_v6  ;;  %v750_v10 = vadd.f32 %v749_v58, %v1833_v55 }
 0x19f   : > { %v1058_v13 = vsel %vm802_vm4, %v1891_v12, %v1042_v7 }
 0x1a0   : > { %1515 = vpow2.f32 %v879_v8  ;;  %v1919_v15 = vsub.f32 0.0, %v750_v10  ;;  %v1074_v62 = vsub.f32 0.0, %v1058_v13 }
 0x1a1   : > { %v1514_v16 = vpop.eup %1513 }
 0x1a2   : > { %v837_v18 = vand.u32 2147483647, %v1919_v15  ;;  %1141 = vmatmul.f32.gmra.mxu2 %v1074_v62  ;;  %v981_v19 = vmul.f32 0.6931472, %v1514_v16  ;;  %v789_v5 = vmax.f32 %v1919_v15, 0.0  ;;  %vm805_vm10 = vcmp.ne.f32.partialorder %v1919_v15, %v1919_v15 }
 0x1a4   : > { %v853_v21 = vsub.f32 0.0, %v837_v18  ;;  %v987_v23 = vsel %vm986_vm5, %v984_v20, %v981_v19 }
 0x1a5   : > { %v752_v24 = vpop.f32.mrf.mxu3  ;;  %v1043_v25 = vadd.f32 %v987_v23, %v787_v9 }
 0x1a6   : > { %v1516_v26 = vpop.eup %1515  ;;  %v881_v12 = vmul.f32 1.442695, %v853_v21  ;;  %v753_v28 = vadd.f32 %v752_v24, %v1833_v55 }
 0x1a7   : > { %v1059_v29 = vsel %vm803_vm6, %v1899_v33, %v1043_v25  ;;  %v988_v31 = vadd.f32 1.0, %v1516_v26  ;;  %v991_v35 = vmul.f32 -0.5, %v1516_v26  ;;  %v994_v40 = vand.u32 2147483647, %v1516_v26 }
 0x1a8   : > { %1517 = vpow2.f32 %v881_v12  ;;  %v1927_v32 = vsub.f32 0.0, %v753_v28  ;;  %v1075_v34 = vsub.f32 0.0, %v1059_v29 }
 0x1a9   : > { %1519 = vlog2.f32 %v988_v31  ;;  %v992_v37 = vadd.f32 1.0, %v991_v35  ;;  %vm995_vm7 = vcmp.lt.f32.partialorder %v994_v40, 0.0004427343 }
 0x1aa   : > { %v838_v36 = vand.u32 2147483647, %v1927_v32  ;;  %1144 = vmatmul.f32.gmra.mxu2 %v1075_v34  ;;  %v790_v20 = vmax.f32 %v1927_v32, 0.0  ;;  %vm806_vm12 = vcmp.ne.f32.partialorder %v1927_v32, %v1927_v32 }
 0x1ab   : > { %v993_v48 = vmul.f32 %v1516_v26, %v992_v37 }
 0x1ac   : > { %v854_v17 = vsub.f32 0.0, %v838_v36 }
 0x1ad   : > { %v755_v39 = vpop.f32.mrf.mxu3 }
 0x1ae   : > { %v1518_v41 = vpop.eup %1517  ;;  %v883_v22 = vmul.f32 1.442695, %v854_v17  ;;  %v756_v42 = vadd.f32 %v755_v39, %v1833_v55 }
 0x1af   : > { %v1520_v44 = vpop.eup %1519  ;;  %v997_v33 = vadd.f32 1.0, %v1518_v41  ;;  %v1000_v45 = vmul.f32 -0.5, %v1518_v41  ;;  %v1003_v57 = vand.u32 2147483647, %v1518_v41 }
 0x1b0   : > { %1521 = vpow2.f32 %v883_v22  ;;  %v1931_v46 = vsub.f32 0.0, %v756_v42  ;;  %v990_v47 = vmul.f32 0.6931472, %v1520_v44 }
 0x1b1   : > { %1523 = vlog2.f32 %v997_v33  ;;  %v1001_v53 = vadd.f32 1.0, %v1000_v45  ;;  %vm1004_vm9 = vcmp.lt.f32.partialorder %v1003_v57, 0.0004427343 }
 0x1b2   : > { %v839_v50 = vand.u32 2147483647, %v1931_v46  ;;  %v996_v51 = vsel %vm995_vm7, %v993_v48, %v990_v47  ;;  %v791_v35 = vmax.f32 %v1931_v46, 0.0  ;;  %vm807_vm14 = vcmp.ne.f32.partialorder %v1931_v46, %v1931_v46 }
 0x1b3   : > { %v1044_v52 = vadd.f32 %v996_v51, %v788_v49  ;;  %v1002_v0 = vmul.f32 %v1518_v41, %v1001_v53 }
 0x1b4   : > { %v855_v54 = vsub.f32 0.0, %v839_v50 }
 0x1b5   : > { %v758_v56 = vpop.f32.mrf.mxu3  ;;  %v1060_v38 = vsel %vm804_vm8, %v1911_v43, %v1044_v52 }
 0x1b6   : > { %v1522_v59 = vpop.eup %1521  ;;  %v885_v27 = vmul.f32 1.442695, %v855_v54  ;;  %v759_v60 = vadd.f32 %v758_v56, %v1833_v55  ;;  %v1076_v61 = vsub.f32 0.0, %v1060_v38 }
 0x1b7   : > { %v1524_v63 = vpop.eup %1523  ;;  %v1006_v1 = vadd.f32 1.0, %v1522_v59  ;;  %v1009_v4 = vmul.f32 -0.5, %v1522_v59  ;;  %v1012_v8 = vand.u32 2147483647, %v1522_v59 }
 0x1b8   : > { %1525 = vpow2.f32 %v885_v27  ;;  %v776_v2 = vsub.f32 0.0, %v759_v60  ;;  %1147 = vmatmul.f32.vlgmr.msrb.gmra.mxu3 %v1076_v61  ;;  %v999_v3 = vmul.f32 0.6931472, %v1524_v63 }
 0x1b9   : > { %1527 = vlog2.f32 %v1006_v1  ;;  %v1010_v55 = vadd.f32 1.0, %v1009_v4  ;;  %vm1013_vm11 = vcmp.lt.f32.partialorder %v1012_v8, 0.0004427343 }
 0x1ba   : > { %v840_v6 = vand.u32 2147483647, %v776_v2  ;;  %v1005_v43 = vsel %vm1004_vm9, %v1002_v0, %v999_v3  ;;  %v792_v44 = vmax.f32 %v776_v2, 0.0  ;;  %vm808_vm0 = vcmp.ne.f32.partialorder %v776_v2, %v776_v2 }
 0x1bb   : > { %v1045_v30 = vadd.f32 %v1005_v43, %v789_v5  ;;  %v1011_v18 = vmul.f32 %v1522_v59, %v1010_v55 }
 0x1bc   : > { %v856_v58 = vsub.f32 0.0, %v840_v6 }
 0x1bd   : > { %v1061_v7 = vsel %vm805_vm10, %v1919_v15, %v1045_v30 }
 0x1be   : > { %v1526_v10 = vpop.eup %1525  ;;  %v887_v11 = vmul.f32 1.442695, %v856_v58  ;;  %v1077_v13 = vsub.f32 0.0, %v1061_v7 }
 0x1bf   : > { %v1528_v14 = vpop.eup %1527  ;;  %v1015_v62 = vadd.f32 1.0, %v1526_v10  ;;  %v1018_v19 = vmul.f32 -0.5, %v1526_v10  ;;  %v1021_v24 = vand.u32 2147483647, %v1526_v10 }
 0x1c0   : > { %1529 = vpow2.f32 %v887_v11  ;;  %1150 = vmatmul.f32.gmra.mxu3 %v1077_v13  ;;  %v1008_v16 = vmul.f32 0.6931472, %v1528_v14 }
 0x1c1   : > { %1531 = vlog2.f32 %v1015_v62  ;;  %v1019_v15 = vadd.f32 1.0, %v1018_v19  ;;  %vm1022_vm13 = vcmp.lt.f32.partialorder %v1021_v24, 0.0004427343 }
 0x1c2   : > { %v1014_v9 = vsel %vm1013_vm11, %v1011_v18, %v1008_v16 }
 0x1c3   : > { %v1046_v21 = vadd.f32 %v1014_v9, %v790_v20  ;;  %v1020_v31 = vmul.f32 %v1526_v10, %v1019_v15 }
 0x1c5   : > { %v1062_v23 = vsel %vm806_vm12, %v1927_v32, %v1046_v21 }
 0x1c6   : > { %v1530_v25 = vpop.eup %1529  ;;  %v1078_v26 = vsub.f32 0.0, %v1062_v23 }
 0x1c7   : > { %v1532_v12 = vpop.eup %1531  ;;  %v1024_v28 = vadd.f32 1.0, %v1530_v25  ;;  %v1027_v34 = vmul.f32 -0.5, %v1530_v25  ;;  %v1030_v39 = vand.u32 2147483647, %v1530_v25 }
 0x1c8   : > { %1153 = vmatmul.f32.gmra.mxu3 %v1078_v26  ;;  %v1017_v29 = vmul.f32 0.6931472, %v1532_v12 }
 0x1c9   : > { %1533 = vlog2.f32 %v1024_v28  ;;  %v1028_v32 = vadd.f32 1.0, %v1027_v34  ;;  %vm1031_vm15 = vcmp.lt.f32.partialorder %v1030_v39, 0.0004427343 }
 0x1ca   : > { %v1023_v36 = vsel %vm1022_vm13, %v1020_v31, %v1017_v29 }
 0x1cb   : > { %v1047_v17 = vadd.f32 %v1023_v36, %v791_v35  ;;  %v1029_v42 = vmul.f32 %v1530_v25, %v1028_v32 }
 0x1cd   : > { %v1063_v37 = vsel %vm807_vm14, %v1931_v46, %v1047_v17  ;;  %v1535_v46 = vld [vmem:[%s2013_s4] sm:$0x7] }
 0x1ce   : > { %v1079_v40 = vsub.f32 0.0, %v1063_v37  ;;  %v1097_v49 = vperm.slane %v1535_v46, 2 }
 0x1cf   : > { %v1534_v41 = vpop.eup %1533 }
 0x1d0   : > { %1156 = vmatmul.f32.gmra.mxu3 %v1079_v40  ;;  %v1026_v22 = vmul.f32 0.6931472, %v1534_v41 }
 0x1d2   : > { %v1032_v33 = vsel %vm1031_vm15, %v1029_v42, %v1026_v22 }
 0x1d3   : > { %v1048_v45 = vadd.f32 %v1032_v33, %v792_v44 }
 0x1d5   : > { %v1064_v47 = vsel %vm808_vm0, %v776_v2, %v1048_v45 }
 0x1d6   : > { %v1080_v48 = vsub.f32 0.0, %v1064_v47 }
 0x1d8   : > { %1159 = vmatmul.f32.gmra.mxu3 %v1080_v48 }
 0x1dd   : > { %v1115_v50 = vpop.f32.mrf.mxu2 }
 0x1de   : > { %v1116_v51 = vadd.f32 %v1115_v50, %v1097_v49 }
 0x1e0   : > { %1163 = vst [vmem:[%s1957_s25] sm:$0xff] %v1116_v51 }
 0x1e5   : > { %v1118_v52 = vpop.f32.mrf.mxu2 }
 0x1e6   : > { %v1119_v53 = vadd.f32 %v1118_v52, %v1097_v49 }
 0x1e8   : > { %1164 = vst [vmem:[%s1957_s25 + $0x8] sm:$0xff] %v1119_v53 }
 0x1ed   : > { %v1121_v54 = vpop.f32.mrf.mxu2 }
 0x1ee   : > { %v1122_v56 = vadd.f32 %v1121_v54, %v1097_v49 }
 0x1f0   : > { %1165 = vst [vmem:[%s1957_s25 + $0x10] sm:$0xff] %v1122_v56 }
 0x1f5   : > { %v1124_v38 = vpop.f32.mrf.mxu2 }
 0x1f6   : > { %v1125_v57 = vadd.f32 %v1124_v38, %v1097_v49 }
 0x1f8   : > { %1166 = vst [vmem:[%s1957_s25 + $0x18] sm:$0xff] %v1125_v57 }
 0x1fd   : > { %v1127_v59 = vpop.f32.mrf.mxu2 }
 0x1fe   : > { %v1128_v27 = vadd.f32 %v1127_v59, %v1097_v49 }
 0x200   : > { %1167 = vst [vmem:[%s1957_s25 + $0x20] sm:$0xff] %v1128_v27 }
 0x205   : > { %v1130_v60 = vpop.f32.mrf.mxu2 }
 0x206   : > { %v1131_v61 = vadd.f32 %v1130_v60, %v1097_v49 }
 0x208   : > { %1168 = vst [vmem:[%s1957_s25 + $0x28] sm:$0xff] %v1131_v61 }
 0x20d   : > { %v1133_v63 = vpop.f32.mrf.mxu2 }
 0x20e   : > { %v1134_v0 = vadd.f32 %v1133_v63, %v1097_v49 }
 0x210   : > { %1169 = vst [vmem:[%s1957_s25 + $0x30] sm:$0xff] %v1134_v0 }
 0x215   : > { %v1136_v1 = vpop.f32.mrf.mxu2 }
 0x216   : > { %v1137_v2 = vadd.f32 %v1136_v1, %v1097_v49 }
 0x218   : > { %1170 = vst [vmem:[%s1957_s25 + $0x38] sm:$0xff] %v1137_v2 }
 0x21d   : > { %v1139_v3 = vpop.f32.mrf.mxu2 }
 0x21e   : > { %v1140_v4 = vadd.f32 %v1139_v3, %v1097_v49 }
 0x220   : > { %1171 = vst [vmem:[%s1957_s25 + $0x40] sm:$0xff] %v1140_v4 }
 0x225   : > { %v1142_v5 = vpop.f32.mrf.mxu2 }
 0x226   : > { %v1143_v6 = vadd.f32 %v1142_v5, %v1097_v49 }
 0x228   : > { %1172 = vst [vmem:[%s1957_s25 + $0x48] sm:$0xff] %v1143_v6 }
 0x22d   : > { %v1145_v43 = vpop.f32.mrf.mxu2 }
 0x22e   : > { %v1146_v30 = vadd.f32 %v1145_v43, %v1097_v49 }
 0x230   : > { %1173 = vst [vmem:[%s1957_s25 + $0x50] sm:$0xff] %v1146_v30 }
 0x23b   : > { %v1148_v58 = vpop.f32.mrf.mxu3 }
 0x23c   : > { %v1149_v55 = vadd.f32 %v1148_v58, %v1097_v49 }
 0x23e   : > { %1174 = vst [vmem:[%s1957_s25 + $0x58] sm:$0xff] %v1149_v55 }
 0x243   : > { %v1151_v7 = vpop.f32.mrf.mxu3 }
 0x244   : > { %v1152_v8 = vadd.f32 %v1151_v7, %v1097_v49 }
 0x246   : > { %1175 = vst [vmem:[%s1957_s25 + $0x60] sm:$0xff] %v1152_v8 }
 0x24b   : > { %v1154_v10 = vpop.f32.mrf.mxu3 }
 0x24c   : > { %v1155_v11 = vadd.f32 %v1154_v10, %v1097_v49 }
 0x24e   : > { %1176 = vst [vmem:[%s1957_s25 + $0x68] sm:$0xff] %v1155_v11 }
 0x253   : > { %v1157_v13 = vpop.f32.mrf.mxu3 }
 0x254   : > { %v1158_v14 = vadd.f32 %v1157_v13, %v1097_v49 }
 0x256   : > { %1177 = vst [vmem:[%s1957_s25 + $0x70] sm:$0xff] %v1158_v14 }
 0x25b   : > { %v1160_v62 = vpop.f32.mrf.mxu3 }
 0x25c   : > { %v1161_v16 = vadd.f32 %v1160_v62, %v1097_v49 }
 0x25e   : > { %1178 = vst [vmem:[%s1957_s25 + $0x78] sm:$0xff] %v1161_v16 }
 0x25f   : > { %1563 = shalt.err (!%p1560_p3)
}
 0x260   : > { %s1600_s15 = smov 128   ;;  %s1601_s23 = smov 8  }
 0x261   : > { %1334 = dma.vmem_to_hbm [thread:$0]  (%p1670_p5), %s1193_s7, 2048, %s1195_s8, %s1180_s9, %s1600_s15, %s1600_s15, %s1601_s23  }
 0x262 PF: > { %p1340_p4 = scmp.ge.s32.totalorder %s1598_s21, 2  ;;  %s1209_s25 = sand.u32 1, %s1586_s18  }
 0x263   : > { %s1210_s26 = scalar_lea.sflag [#allocation3], %s1209_s25 }
 0x264   : > { %p1337_p7 = pnand %p1340_p4, %p1674_p6 }
 0x266   : > { %p1338_p8 = pneg %p1337_p7 }
 0x268   : > { %1581 = dma.done.wait (%p1338_p8), %s1210_s26, 2048  }
 0x269   : > { %1583 = vsyncadd (%p1338_p8), %s1210_s26, 4294965248  ;;  %p15_p9 = scmp.ge.s32.totalorder %s1657_s24, 4   ;;  %s2017_s18 = smov %s1590_s19 }
 0x26a   : > { %s2018_s19 = smov %s1594_s20  ;;  %s2019_s20 = smov %s1668_s27 }
 0x26b   : > { %s2020_s21 = smov %s1657_s24  ;;  %17 = sbr.rel (!%p15_p9) target bundleno = 3 (0x3), region = 75 }
 0x270   :  { %1216 = vsyncpa [#allocation3], 1 }
 0x271   :  { %1218 = vsyncpa [#allocation3 + $0x1], 1 }

</bundles_post_ra>
